<compile_context>
chip_gen: v6e
topology: v6e:2x2x1
jax: 0.10.0
libtpu: 0.0.40
codegen_flags: <defaults>
</compile_context>

<pallas_src>
import functools

import numpy as np

import jax
import jax.numpy as jnp
from jax.experimental import pallas as pl
from jax.experimental.pallas import tpu as pltpu

N_FEATS = 32
BN_EPS = 1e-5
KSIZE = 3
STRIDE = 2
KPAD = 32          # conv1 contraction dim padded 27 -> 32 (sublane aligned)
OUT_LANES = 128    # lane-dense packed output row


def _vmem():
    return pl.BlockSpec(memory_space=pltpu.MemorySpace.VMEM)


def _evaluator_kernel(p_ref, w1_ref, b1_ref, g_ref, wf_ref, rsel_ref, bf_ref,
                      out_ref, *, n_batch):
    """Fully fused Evaluator forward (eval mode), reshape/slice-free.

    p    : (N*HW, 32)   bf16  conv1 im2col patches (27 real cols + 5 zero pad)
    w1   : (32, 9C)     bf16  conv1 weight (BN folded), tap-duplicated columns
    b1   : (1, 9C)      f32   conv1 bias (BN folded), tap-duplicated
    g    : (N*HW, 9C)   f32   exact 0/1 tap-membership mask
    wf   : (9C, 1)      f32   conv2(tap-major) @ (wl1-wl0) / (H2*W2)
    rsel : (N, N*HW)    f32   exact 0/1 per-batch row-block summation
    bf   : (1, 1)       f32   conv2_b @ (wl1-wl0) + (bl1-bl0)
    out  : (N, 128)     f32   [p0, p1, logit_diff, 0...]
    """
    # conv1 (+ folded eval BN) + ReLU, output channels duplicated per conv2 tap.
    y = jnp.dot(p_ref[...], w1_ref[...], preferred_element_type=jnp.float32)
    y = jnp.maximum(y + b1_ref[...], 0.0)                       # (N*HW, 9C) f32

    # conv2 + avg-pool + linear class-difference, all folded:
    #   zero out taps that do not see this spatial position, then contract the
    #   joint (tap, channel) axis with one K=9C matmul, then sum each batch's
    #   row block with one tiny matmul.
    yg = y * g_ref[...]                                         # (N*HW, 9C)
    z = jnp.dot(yg, wf_ref[...], preferred_element_type=jnp.float32)   # (N*HW,1)
    d = jnp.dot(rsel_ref[...], z,
                preferred_element_type=jnp.float32) + bf_ref[...]      # (N, 1)

    # 2-class softmax == sigmoid of the logit difference (exact).
    p1 = 1.0 / (1.0 + jnp.exp(-d))                              # (N, 1)

    lane = jax.lax.broadcasted_iota(jnp.int32, (n_batch, OUT_LANES), 1)
    p_b = jnp.broadcast_to(p1, (n_batch, OUT_LANES))
    d_b = jnp.broadcast_to(d, (n_batch, OUT_LANES))
    out_ref[...] = jnp.where(lane == 0, 1.0 - p_b,
                             jnp.where(lane == 1, p_b,
                                       jnp.where(lane == 2, d_b, 0.0)))


def _conv_w_to_mat(w_oikk):
    """torch conv weight (C_out, C_in, kh, kw) -> (kh*kw*C_in, C_out), tap-major."""
    c_out, c_in, kh, kw = w_oikk.shape
    return jnp.transpose(w_oikk, (2, 3, 1, 0)).reshape(kh * kw * c_in, c_out)


def _im2col(x_nhwc, k, s):
    """Valid (no-pad) kxk stride-s patches -> (N*Ho*Wo, k*k*C), tap-major cols."""
    n, h, w, c = x_nhwc.shape
    ho = (h - k) // s + 1
    wo = (w - k) // s + 1
    cols = [x_nhwc[:, i:i + s * ho:s, j:j + s * wo:s, :]
            for i in range(k) for j in range(k)]
    patches = jnp.stack(cols, axis=3)                 # (N, Ho, Wo, k*k, C)
    return patches.reshape(n * ho * wo, k * k * c), (n, ho, wo)


def _tap_mask(h1, w1, k=KSIZE, s=STRIDE):
    """Exact 0/1 constant (k*k, h1*w1): row t marks the conv1-output positions
    that tap t of the stride-s conv2 reads (batch independent, 81 iters)."""
    h2 = (h1 - k) // s + 1
    w2 = (w1 - k) // s + 1
    m = np.zeros((k * k, h1 * w1), np.float32)
    for t in range(k * k):
        i, j = divmod(t, k)
        for ho in range(h2):
            for wo in range(w2):
                m[t, (s * ho + i) * w1 + (s * wo + j)] = 1.0
    return m


def init_params(key, n_feats):
    ks = jax.random.split(key, 10)
    p = {}
    # Conv2d(3, n_feats, 3, stride=2)
    p["conv1_w"] = jax.random.normal(ks[0], (n_feats, 3, KSIZE, KSIZE), jnp.float32) * 0.1
    p["conv1_b"] = jax.random.normal(ks[1], (n_feats,), jnp.float32) * 0.1
    # Conv2d(n_feats, n_feats, 3, stride=2)
    p["conv2_w"] = jax.random.normal(ks[2], (n_feats, n_feats, KSIZE, KSIZE), jnp.float32) * 0.05
    p["conv2_b"] = jax.random.normal(ks[3], (n_feats,), jnp.float32) * 0.05
    # BatchNorm2d(n_feats) eval-mode running stats + affine.
    p["bn_gamma"] = 1.0 + 0.1 * jax.random.normal(ks[4], (n_feats,), jnp.float32)
    p["bn_beta"] = 0.1 * jax.random.normal(ks[5], (n_feats,), jnp.float32)
    p["bn_mean"] = 0.1 * jax.random.normal(ks[6], (n_feats,), jnp.float32)
    p["bn_var"] = 0.5 + 0.5 * jnp.abs(jax.random.normal(ks[7], (n_feats,), jnp.float32))
    # Conv2d(n_feats, 2, kernel_size=1)
    p["lin_w"] = jax.random.normal(ks[8], (2, n_feats, 1, 1), jnp.float32) * 0.1
    p["lin_b"] = jax.random.normal(ks[9], (2,), jnp.float32) * 0.1
    return p


@jax.jit
def evaluator_forward(params, x_nchw):
    """Eval-mode Evaluator.forward. Returns (action, probs); the torch module
    returns (action, m) with m=None in eval. action is per-sample
    (softmax[:,1] > 0.5) -> int32 (== torch behaviour for batch==1)."""
    c = params["conv1_b"].shape[0]
    ntap = KSIZE * KSIZE
    q = ntap * c
    kdim = ntap * 3

    x = jnp.transpose(x_nchw, (0, 2, 3, 1))                      # NCHW -> NHWC
    patches, (n, h1, w1) = _im2col(x, KSIZE, STRIDE)             # (N*HW, 27)
    hw = h1 * w1
    h2 = (h1 - KSIZE) // STRIDE + 1
    w2 = (w1 - KSIZE) // STRIDE + 1

    # Fold eval-mode BN into conv1's weight & bias (host side, O(C)).
    scale = params["bn_gamma"] * jax.lax.rsqrt(params["bn_var"] + BN_EPS)
    w1f = _conv_w_to_mat(params["conv1_w"]) * scale[None, :]     # (27, C)
    b1f = (params["conv1_b"] - params["bn_mean"]) * scale + params["bn_beta"]

    # Tap-duplicated conv1 weight/bias, contraction dim padded 27 -> 32.
    w1dup = jnp.pad(jnp.tile(w1f, (1, ntap)), ((0, KPAD - kdim), (0, 0)))  # (32, 9C)
    b1dup = jnp.tile(b1f, (ntap,)).reshape(1, q)                 # (1, 9C)
    patches = jnp.pad(patches, ((0, 0), (0, KPAD - kdim)))       # (N*HW, 32)

    # Exact 0/1 tap mask, expanded over channels and tiled over batch (O(N)).
    gexp = np.repeat(_tap_mask(h1, w1).T, c, axis=1)             # (HW, 9C)
    g_tiled = jnp.asarray(np.tile(gexp, (n, 1)), jnp.float32)    # (N*HW, 9C)

    # conv2 (tap-major) + avg-pool (1/(H2*W2)) + linear class-difference folded.
    w2mat = _conv_w_to_mat(params["conv2_w"])                    # (9C, C)
    wl = params["lin_w"].reshape(2, c)                           # (2, C)
    wd = wl[1] - wl[0]                                           # (C,)
    bd = params["lin_b"][1] - params["lin_b"][0]
    wfinal = ((w2mat @ wd) / float(h2 * w2)).reshape(q, 1)       # (9C, 1) f32
    bfinal = (jnp.dot(params["conv2_b"], wd) + bd).reshape(1, 1)

    # Per-batch row-block summation (exact 0/1; tiny). For large batch this
    # should become a grid axis instead (parallel on v7x's 2 TCs).
    rsel_np = np.zeros((n, n * hw), np.float32)
    for b in range(n):
        rsel_np[b, b * hw:(b + 1) * hw] = 1.0
    rsel = jnp.asarray(rsel_np)

    kern = functools.partial(_evaluator_kernel, n_batch=n)
    out = pl.pallas_call(
        kern,
        out_shape=jax.ShapeDtypeStruct((n, OUT_LANES), jnp.float32),
        in_specs=[_vmem()] * 7,
        out_specs=_vmem(),
    )(patches.astype(jnp.bfloat16), w1dup.astype(jnp.bfloat16),
      b1dup, g_tiled, wfinal, rsel, bfinal)

    probs = out[:, :2]
    action = (out[:, 2] > 0.0).astype(jnp.int32)
    return action, probs


def _reference_forward(params, x_nchw):
    """Pure-JAX (XLA, f32) reference of the eval-mode forward, for validation."""
    dn = ("NCHW", "OIHW", "NCHW")
    y = jax.lax.conv_general_dilated(x_nchw, params["conv1_w"], (STRIDE, STRIDE),
                                     "VALID", dimension_numbers=dn)
    y = y + params["conv1_b"][None, :, None, None]
    scale = params["bn_gamma"] / jnp.sqrt(params["bn_var"] + BN_EPS)
    y = (y - params["bn_mean"][None, :, None, None]) * scale[None, :, None, None] \
        + params["bn_beta"][None, :, None, None]
    y = jnp.maximum(y, 0.0)
    y = jax.lax.conv_general_dilated(y, params["conv2_w"], (STRIDE, STRIDE),
                                     "VALID", dimension_numbers=dn)
    y = y + params["conv2_b"][None, :, None, None]
    pooled = jnp.mean(y, axis=(2, 3))                            # (N, C)
    logits = pooled @ params["lin_w"].reshape(2, -1).T + params["lin_b"]
    probs = jax.nn.softmax(logits, axis=-1)
    action = (probs[:, 1] > 0.5).astype(jnp.int32)
    return action, probs


if __name__ == "__main__":
    key = jax.random.PRNGKey(0)
    pkey, xkey = jax.random.split(key)
    params = init_params(pkey, N_FEATS)
    # small shapes consistent with the module: batch=2, 3 input channels, 16x16
    x = jax.random.normal(xkey, (2, 3, 16, 16), jnp.float32)     # NCHW like torch

    action, probs = evaluator_forward(params, x)
    jax.block_until_ready((action, probs))

    # Validate against a pure-JAX f32 reference. The kernel uses bf16 operands
    # for the main matmul (f32 accumulation), so tolerances are set accordingly.
    ref_action, ref_probs = _reference_forward(params, x)
    np.testing.assert_allclose(np.asarray(probs), np.asarray(ref_probs),
                               rtol=1e-2, atol=3e-3)
    safe = np.abs(np.asarray(ref_probs)[:, 1] - 0.5) > 1e-2      # away from threshold
    assert np.all(np.asarray(action)[safe] == np.asarray(ref_action)[safe])

    print("KERNEL_OK")
</pallas_src>

<mosaic_0001>
module attributes {stable_mosaic.version = 11 : i64} {
  func.func @_evaluator_kernel(%arg0: memref<98x32xbf16, #tpu.memory_space<vmem>>, %arg1: memref<32x288xbf16, #tpu.memory_space<vmem>>, %arg2: memref<1x288xf32, #tpu.memory_space<vmem>>, %arg3: memref<98x288xf32, #tpu.memory_space<vmem>>, %arg4: memref<288x1xf32, #tpu.memory_space<vmem>>, %arg5: memref<2x98xf32, #tpu.memory_space<vmem>>, %arg6: memref<1x1xf32, #tpu.memory_space<vmem>>, %arg7: memref<2x128xf32, #tpu.memory_space<vmem>>) attributes {dimension_semantics = [], scalar_prefetch = 0 : i64, scratch_operands = 0 : i64, tpu.core_type = #tpu.core_type<tc>} {
    %c0 = arith.constant 0 : index
    %c0_0 = arith.constant 0 : index
    %0 = vector.load %arg0[%c0, %c0_0] : memref<98x32xbf16, #tpu.memory_space<vmem>>, vector<98x32xbf16>
    %c0_1 = arith.constant 0 : index
    %c0_2 = arith.constant 0 : index
    %1 = vector.load %arg1[%c0_1, %c0_2] : memref<32x288xbf16, #tpu.memory_space<vmem>>, vector<32x288xbf16>
    %cst = arith.constant dense<0.000000e+00> : vector<98x288xf32>
    %2 = tpu.matmul %0, %1, %cst {dimension_numbers = #tpu.dot_dimension_numbers<[1], [0], [0], [1], [0, 0, 1, 1], [], []>} : vector<98x32xbf16>, vector<32x288xbf16>, vector<98x288xf32> -> vector<98x288xf32>
    %c0_3 = arith.constant 0 : index
    %c0_4 = arith.constant 0 : index
    %3 = vector.load %arg2[%c0_3, %c0_4] : memref<1x288xf32, #tpu.memory_space<vmem>>, vector<1x288xf32>
    %4 = vector.broadcast %3 : vector<1x288xf32> to vector<98x288xf32>
    %5 = arith.addf %2, %4 : vector<98x288xf32>
    %cst_5 = arith.constant 0.000000e+00 : f32
    %6 = vector.broadcast %cst_5 : f32 to vector<98x288xf32>
    %7 = arith.maximumf %5, %6 : vector<98x288xf32>
    %c0_6 = arith.constant 0 : index
    %c0_7 = arith.constant 0 : index
    %8 = vector.load %arg3[%c0_6, %c0_7] : memref<98x288xf32, #tpu.memory_space<vmem>>, vector<98x288xf32>
    %9 = arith.mulf %7, %8 : vector<98x288xf32>
    %c0_8 = arith.constant 0 : index
    %c0_9 = arith.constant 0 : index
    %10 = vector.load %arg4[%c0_8, %c0_9] : memref<288x1xf32, #tpu.memory_space<vmem>>, vector<288x1xf32>
    %cst_10 = arith.constant dense<0.000000e+00> : vector<98x1xf32>
    %11 = tpu.matmul %9, %10, %cst_10 {dimension_numbers = #tpu.dot_dimension_numbers<[1], [0], [0], [1], [0, 0, 1, 1], [], []>} : vector<98x288xf32>, vector<288x1xf32>, vector<98x1xf32> -> vector<98x1xf32>
    %c0_11 = arith.constant 0 : index
    %c0_12 = arith.constant 0 : index
    %12 = vector.load %arg5[%c0_11, %c0_12] : memref<2x98xf32, #tpu.memory_space<vmem>>, vector<2x98xf32>
    %cst_13 = arith.constant dense<0.000000e+00> : vector<2x1xf32>
    %13 = tpu.matmul %12, %11, %cst_13 {dimension_numbers = #tpu.dot_dimension_numbers<[1], [0], [0], [1], [0, 0, 1, 1], [], []>} : vector<2x98xf32>, vector<98x1xf32>, vector<2x1xf32> -> vector<2x1xf32>
    %c0_14 = arith.constant 0 : index
    %c0_15 = arith.constant 0 : index
    %14 = vector.load %arg6[%c0_14, %c0_15] : memref<1x1xf32, #tpu.memory_space<vmem>>, vector<1x1xf32>
    %15 = vector.broadcast %14 : vector<1x1xf32> to vector<2x1xf32>
    %16 = arith.addf %13, %15 : vector<2x1xf32>
    %cst_16 = arith.constant 0.000000e+00 : f32
    %17 = vector.broadcast %cst_16 : f32 to vector<2x1xf32>
    %18 = arith.subf %17, %16 : vector<2x1xf32>
    %19 = math.exp %18 : vector<2x1xf32>
    %cst_17 = arith.constant 1.000000e+00 : f32
    %20 = vector.broadcast %cst_17 : f32 to vector<2x1xf32>
    %21 = arith.addf %20, %19 : vector<2x1xf32>
    %cst_18 = arith.constant 1.000000e+00 : f32
    %22 = vector.broadcast %cst_18 : f32 to vector<2x1xf32>
    %23 = arith.divf %22, %21 : vector<2x1xf32>
    %24 = tpu.iota {dimensions = array<i32: 1>} : vector<2x128xi32>
    %25 = vector.shape_cast %23 : vector<2x1xf32> to vector<2x1xf32>
    %26 = vector.broadcast %25 : vector<2x1xf32> to vector<2x128xf32>
    %27 = vector.shape_cast %16 : vector<2x1xf32> to vector<2x1xf32>
    %28 = vector.broadcast %27 : vector<2x1xf32> to vector<2x128xf32>
    %c0_i32 = arith.constant 0 : i32
    %29 = vector.broadcast %c0_i32 : i32 to vector<2x128xi32>
    %30 = arith.cmpi eq, %24, %29 : vector<2x128xi32>
    %cst_19 = arith.constant 1.000000e+00 : f32
    %31 = vector.broadcast %cst_19 : f32 to vector<2x128xf32>
    %32 = arith.subf %31, %26 : vector<2x128xf32>
    %c1_i32 = arith.constant 1 : i32
    %33 = vector.broadcast %c1_i32 : i32 to vector<2x128xi32>
    %34 = arith.cmpi eq, %24, %33 : vector<2x128xi32>
    %c2_i32 = arith.constant 2 : i32
    %35 = vector.broadcast %c2_i32 : i32 to vector<2x128xi32>
    %36 = arith.cmpi eq, %24, %35 : vector<2x128xi32>
    %cst_20 = arith.constant 0.000000e+00 : f32
    %37 = vector.broadcast %cst_20 : f32 to vector<2x128xf32>
    %38 = arith.select %36, %28, %37 : vector<2x128xi1>, vector<2x128xf32>
    %39 = arith.select %34, %26, %38 : vector<2x128xi1>, vector<2x128xf32>
    %40 = arith.select %30, %32, %39 : vector<2x128xi1>, vector<2x128xf32>
    %c0_21 = arith.constant 0 : index
    %c0_22 = arith.constant 0 : index
    %41 = vector.load %arg7[%c0_21, %c0_22] : memref<2x128xf32, #tpu.memory_space<vmem>>, vector<2x128xf32>
    tpu.vector_store %arg7[%c0_21, %c0_22], %40 {strides = array<i32>} : memref<2x128xf32, #tpu.memory_space<vmem>>, vector<2x128xf32>,
    return
  }
}

</mosaic_0001>

<bundles_post_ra>
// kernel: tile.0
= control target key start
LH: loop header
LB: loop body
LE: loop exit
PB: predicated region body
PF: predicated region fallthrough
CT: control target
= control target key end

     0   :  { %s1953_s18 = smov 3  ;;  %s1955_s19 = smov 12  ;;  %vm1005_vm0 = vcmask 1043458   ;;  %vm1010_vm1 = vcmask 1045508   ;;  %vm1015_vm2 = vcmask 1047558   ;;  %vm1072_vm3 = vcmask 1042434   ;;  %s2312_s0 = inlined_call_operand.vmem [shape: bf16[27,9,32], index: 0, kind: input, shape index: {}]   ;;  %s2313_s1 = inlined_call_operand.vmem [shape: bf16[27,288], index: 1, kind: output, shape index: {}]  }
   0x1   :  { %v1859_v0 = vld [vmem:[%s2312_s0 + $0xc8] sm:$0xff]   ;;  %v1860_v1 = vld [vmem:[%s2312_s0 + $0xc0] sm:$0xff]   ;;  %v1861_v2 = vld [vmem:[%s2312_s0 + $0xb8] sm:$0xff]   ;;  %s1963_s24 = smov 48  ;;  %s1970_s27 = smov 3  ;;  %vm1077_vm4 = vcmask 1044483  }
   0x2   :  { %v1726_v3 = vunpack.c.l.bf16 %v1859_v0  ;;  %v1727_v4 = vunpack.c.h.bf16 %v1859_v0  ;;  %v1730_v5 = vunpack.c.l.bf16 %v1860_v1  ;;  %v1731_v6 = vunpack.c.h.bf16 %v1860_v1  ;;  %v1862_v7 = vld [vmem:[%s2312_s0 + $0xb0] sm:$0xff]   ;;  %v1863_v8 = vld [vmem:[%s2312_s0 + $0xa8] sm:$0xff]   ;;  %v1864_v9 = vld [vmem:[%s2312_s0 + $0xa0] sm:$0xff]   ;;  %s1985_s5 = smov 12  ;;  %s1987_s6 = smov 48 }
   0x3   :  { %v1734_v10 = vunpack.c.l.bf16 %v1861_v2  ;;  %v1735_v11 = vunpack.c.h.bf16 %v1861_v2  ;;  %v1738_v12 = vunpack.c.l.bf16 %v1862_v7  ;;  %v1739_v13 = vunpack.c.h.bf16 %v1862_v7  ;;  %v1865_v14 = vld [vmem:[%s2312_s0 + $0x98] sm:$0xff]   ;;  %v1866_v15 = vld [vmem:[%s2312_s0 + $0x90] sm:$0xff]   ;;  %v1875_v23 = vld [vmem:[%s2312_s0 + $0x48] sm:$0xff]   ;;  %s1998_s13 = smov 192  ;;  %s2000_s14 = smov 3 }
   0x4   :  { %v1968_v16 = vld [vmem:[%s2312_s0 + $0xd0] sm:$0xff]   ;;  %53 = vst [vmem:[#allocation1 + $0x198] sm:$0xff] %v1727_v4  ;;  %69 = vst [vmem:[#allocation1 + $0x190] sm:$0xff] %v1726_v3  ;;  %v1742_v17 = vunpack.c.l.bf16 %v1863_v8  ;;  %v1743_v18 = vunpack.c.h.bf16 %v1863_v8  ;;  %v1746_v19 = vunpack.c.l.bf16 %v1864_v9  ;;  %v1747_v20 = vunpack.c.h.bf16 %v1864_v9  ;;  %v1975_v21 = vld [vmem:[%s2312_s0 + $0x78] sm:$0xff]   ;;  %s2014_s23 = smov 12  ;;  %s2016_s25 = smov 48 }
   0x5   :  { %85 = vst [vmem:[#allocation1 + $0x188] sm:$0xff] %v1731_v6  ;;  %101 = vst [vmem:[#allocation1 + $0x180] sm:$0xff] %v1730_v5  ;;  %v1980_v22 = vld [vmem:[%s2312_s0 + $0x50] sm:$0xff]   ;;  %v1750_v24 = vunpack.c.l.bf16 %v1865_v14  ;;  %v1751_v25 = vunpack.c.h.bf16 %v1865_v14  ;;  %v1754_v26 = vunpack.c.l.bf16 %v1866_v15  ;;  %v1755_v27 = vunpack.c.h.bf16 %v1866_v15  ;;  %v1876_v28 = vld [vmem:[%s2312_s0 + $0x40] sm:$0xff]   ;;  %s2026_s2 = smov 192  ;;  %s2028_s3 = smov 3 }
   0x6   :  { %117 = vst [vmem:[#allocation1 + $0x178] sm:$0xff] %v1735_v11  ;;  %133 = vst [vmem:[#allocation1 + $0x170] sm:$0xff] %v1734_v10  ;;  %v1877_v29 = vld [vmem:[%s2312_s0 + $0x38] sm:$0xff]   ;;  %v1878_v30 = vld [vmem:[%s2312_s0 + $0x30] sm:$0xff]   ;;  %v1722_v31 = vunpack.c.l.bf16 %v1968_v16  ;;  %v1767_v32 = vunpack.c.h.bf16 %v1975_v21  ;;  %v1787_v33 = vunpack.c.h.bf16 %v1980_v22  ;;  %v1790_v34 = vunpack.c.l.bf16 %v1875_v23  ;;  %s2040_s10 = smov 12  ;;  %s2042_s11 = smov 48 }
   0x7   :  { %149 = vst [vmem:[#allocation1 + $0x168] sm:$0xff] %v1739_v13  ;;  %165 = vst [vmem:[#allocation1 + $0x160] sm:$0xff] %v1738_v12  ;;  %v1879_v35 = vld [vmem:[%s2312_s0 + $0x28] sm:$0xff]   ;;  %v1880_v36 = vld [vmem:[%s2312_s0 + $0x20] sm:$0xff]   ;;  %v1791_v38 = vunpack.c.h.bf16 %v1875_v23  ;;  %v1794_v39 = vunpack.c.l.bf16 %v1876_v28  ;;  %v1795_v40 = vunpack.c.h.bf16 %v1876_v28  ;;  %v1798_v41 = vunpack.c.l.bf16 %v1877_v29  ;;  %s2050_s20 = smov 192  ;;  %s2052_s21 = smov 3 }
   0x8   :  { %181 = vst [vmem:[#allocation1 + $0x158] sm:$0xff] %v1743_v18  ;;  %197 = vst [vmem:[#allocation1 + $0x150] sm:$0xff] %v1742_v17  ;;  %v1881_v37 = vld [vmem:[%s2312_s0 + $0x18] sm:$0xff]   ;;  %v1882_v42 = vld [vmem:[%s2312_s0 + $0x10] sm:$0xff]   ;;  %v1799_v44 = vunpack.c.h.bf16 %v1877_v29  ;;  %v1802_v45 = vunpack.c.l.bf16 %v1878_v30  ;;  %v1803_v46 = vunpack.c.h.bf16 %v1878_v30  ;;  %v1806_v47 = vunpack.c.l.bf16 %v1879_v35  ;;  %s2058_s28 = smov 12  ;;  %s2060_s29 = smov 48 }
   0x9   :  { %213 = vst [vmem:[#allocation1 + $0x148] sm:$0xff] %v1747_v20  ;;  %229 = vst [vmem:[#allocation1 + $0x140] sm:$0xff] %v1746_v19  ;;  %v2024_v43 = vld [vmem:[%s2312_s0] sm:$0xff]   ;;  %v2033_v48 = vld [vmem:[%s2312_s0 + $0x70] sm:$0xff]   ;;  %v1807_v50 = vunpack.c.h.bf16 %v1879_v35  ;;  %v1810_v51 = vunpack.c.l.bf16 %v1880_v36  ;;  %v1811_v52 = vunpack.c.h.bf16 %v1880_v36  ;;  %v1814_v53 = vunpack.c.l.bf16 %v1881_v37  ;;  %s2077_s9 = smov 3  ;;  %s2079_s12 = smov 12 }
   0xa   :  { %245 = vst [vmem:[#allocation1 + $0x138] sm:$0xff] %v1751_v25  ;;  %261 = vst [vmem:[#allocation1 + $0x130] sm:$0xff] %v1750_v24  ;;  %v2038_v49 = vld [vmem:[%s2312_s0 + $0x68] sm:$0xff]   ;;  %v1872_v54 = vld [vmem:[%s2312_s0 + $0x60] sm:$0xff]   ;;  %v1815_v56 = vunpack.c.h.bf16 %v1881_v37  ;;  %v1818_v57 = vunpack.c.l.bf16 %v1882_v42  ;;  %v1819_v58 = vunpack.c.h.bf16 %v1882_v42  ;;  %v1826_v59 = vunpack.c.l.bf16 %v2024_v43  ;;  %s2082_s15 = smov 48  ;;  %s2084_s16 = smov 192 }
   0xb   :  { %277 = vst [vmem:[#allocation1 + $0x128] sm:$0xff] %v1755_v27  ;;  %293 = vst [vmem:[#allocation1 + $0x120] sm:$0xff] %v1754_v26  ;;  %v1873_v55 = vld [vmem:[%s2312_s0 + $0x58] sm:$0xff]   ;;  %v1883_v60 = vld [vmem:[%s2312_s0 + $0x8] sm:$0xff]   ;;  %v1766_v63 = vunpack.c.l.bf16 %v1975_v21  ;;  %v1770_v0 = vunpack.c.l.bf16 %v2033_v48  ;;  %v1774_v1 = vunpack.c.l.bf16 %v2038_v49  ;;  %v1778_v2 = vunpack.c.l.bf16 %v1872_v54  ;;  %s2103_s17 = smov 192  ;;  %s2314_s22 = smov 96  }
   0xc   :  { %37 = vst [vmem:[#allocation1 + $0x1a0] sm:$0xff] %v1722_v31  ;;  %373 = vst [vmem:[#allocation1 + $0xf8] sm:$0xff] %v1767_v32  ;;  %v2065_v61 = vld [vmem:[%s2312_s0 + $0x88] sm:$0xff]   ;;  %v2070_v62 = vld [vmem:[%s2312_s0 + $0x80] sm:$0xff]   ;;  %s2075_s0 = smov 192  ;;  %v1779_v3 = vunpack.c.h.bf16 %v1872_v54  ;;  %v1782_v4 = vunpack.c.l.bf16 %v1873_v55  ;;  %v1783_v5 = vunpack.c.h.bf16 %v1873_v55  ;;  %v1786_v6 = vunpack.c.l.bf16 %v1980_v22  ;;  %s2109_s26 = smov 12 }
   0xd   :  { %533 = vst [vmem:[#allocation1 + $0xa8] sm:$0xff] %v1787_v33  ;;  %581 = vst [vmem:[#allocation1 + $0x90] sm:$0xff] %v1790_v34  ;;  %v1822_v7 = vunpack.c.l.bf16 %v1883_v60  ;;  %v1758_v8 = vunpack.c.l.bf16 %v2065_v61  ;;  %v1762_v9 = vunpack.c.l.bf16 %v2070_v62  ;;  %v1823_v13 = vunpack.c.h.bf16 %v1883_v60  ;;  %v985_v21 = vld [vmem:[#allocation1 + $0x180] ss:$4 sm:$0x7]   ;;  %s2116_s30 = smov 192 }
   0xe   :  { %565 = vst [vmem:[#allocation1 + $0x98] sm:$0xff] %v1791_v38  ;;  %597 = vst [vmem:[#allocation1 + $0x88] sm:$0xff] %v1795_v40  ;;  %v1827_v14 = vunpack.c.h.bf16 %v2024_v43  ;;  %v1771_v15 = vunpack.c.h.bf16 %v2033_v48  ;;  %v1775_v17 = vunpack.c.h.bf16 %v2038_v49  ;;  %v1723_v16 = vunpack.c.h.bf16 %v1968_v16  ;;  %v975_v20 = vld [vmem:[#allocation1 + $0x160] ss:$4 sm:$0x7]   ;;  %s2123_s4 = smov 96 }
   0xf   :  { %613 = vst [vmem:[#allocation1 + $0x80] sm:$0xff] %v1794_v39  ;;  %645 = vst [vmem:[#allocation1 + $0x70] sm:$0xff] %v1798_v41  ;;  %v1759_v23 = vunpack.c.h.bf16 %v2065_v61  ;;  %v1763_v24 = vunpack.c.h.bf16 %v2070_v62  ;;  %s2125_s7 = smov 3  ;;  %vm867_vm5 = vcmask 261120   ;;  %vm1082_vm6 = vcmask 1046533   ;;  %s2128_s8 = smov 12 }
  0x10   :  { %629 = vst [vmem:[#allocation1 + $0x78] sm:$0xff] %v1799_v44  ;;  %661 = vst [vmem:[#allocation1 + $0x68] sm:$0xff] %v1803_v46  ;;  %vm1086_vm7 = vcmask 1047559   ;;  %vm1019_vm8 = vcmask 1048320   ;;  %vm1185_vm9 = vcmask 785920   ;;  %vm1351_vm10 = vcmask 523520  }
  0x11   :  { %677 = vst [vmem:[#allocation1 + $0x60] sm:$0xff] %v1802_v45  ;;  %709 = vst [vmem:[#allocation1 + $0x50] sm:$0xff] %v1806_v47 }
  0x12   :  { %693 = vst [vmem:[#allocation1 + $0x58] sm:$0xff] %v1807_v50  ;;  %725 = vst [vmem:[#allocation1 + $0x48] sm:$0xff] %v1811_v52  ;;  %v1149_v10 = vld [vmem:[#allocation1 + $0x127] ss:$16 sm:%s1953_s18]   ;;  %s2095_s18 = smov 3 }
  0x13   :  { %741 = vst [vmem:[#allocation1 + $0x40] sm:$0xff] %v1810_v51  ;;  %773 = vst [vmem:[#allocation1 + $0x30] sm:$0xff] %v1814_v53  ;;  %v1152_v11 = vld [vmem:[#allocation1 + $0x127] ss:$16 sm:%s1955_s19]   ;;  %s2097_s19 = smov 12 }
  0x14   :  { %757 = vst [vmem:[#allocation1 + $0x38] sm:$0xff] %v1815_v56  ;;  %789 = vst [vmem:[#allocation1 + $0x28] sm:$0xff] %v1819_v58  ;;  %v1157_v12 = vld [vmem:[#allocation1 + $0x127] ss:$16 sm:%s1963_s24]   ;;  %v1154_v18 = vsel %vm1005_vm0, %v1152_v11, %v1149_v10  ;;  %s2101_s24 = smov 48 }
  0x15   :  { %805 = vst [vmem:[#allocation1 + $0x20] sm:$0xff] %v1818_v57  ;;  %865 = vst [vmem:[#allocation1] sm:$0xff] %v1826_v59  ;;  %v1159_v19 = vsel %vm1010_vm1, %v1157_v12, %v1154_v18  ;;  %v1097_v22 = vld [vmem:[#allocation1 + $0x187] ss:$16 sm:%s1970_s27]   ;;  %s2107_s27 = smov 3 }
  0x16   :  { %389 = vst [vmem:[#allocation1 + $0xf0] sm:$0xff] %v1766_v63  ;;  %421 = vst [vmem:[#allocation1 + $0xe0] sm:$0xff] %v1770_v0  ;;  %1160 = vrot.lane.b32.xlu0 %v1159_v19, %s2314_s22  ;;  %v1105_v25 = vld [vmem:[#allocation1 + $0x123] ss:$16 sm:%s1987_s6]   ;;  %s2114_s6 = smov 48  ;;  %s2130_s22 = smov 48 }
  0x17   :  { %453 = vst [vmem:[#allocation1 + $0xd0] sm:$0xff] %v1774_v1  ;;  %469 = vst [vmem:[#allocation1 + $0xc8] sm:$0xff] %v1779_v3  ;;  %v905_v30 = vld [vmem:[#allocation1 + $0x80] ss:$4 sm:$0x7]  }
  0x18   :  { %485 = vst [vmem:[#allocation1 + $0xc0] sm:$0xff] %v1778_v2  ;;  %501 = vst [vmem:[#allocation1 + $0xb8] sm:$0xff] %v1783_v5  ;;  %v1071_v40 = vld [vmem:[#allocation1 + $0x1a1] sm:$0x4]   ;;  %v1237_v18 = vld [vmem:[#allocation1 + $0x1a0] sm:$0x4]  }
  0x19   :  { %517 = vst [vmem:[#allocation1 + $0xb0] sm:$0xff] %v1782_v4  ;;  %549 = vst [vmem:[#allocation1 + $0xa0] sm:$0xff] %v1786_v6  ;;  %v1085_v5 = vld [vmem:[#allocation1 + $0x13c] sm:$0x80]  }
  0x1a   :  { %837 = vst [vmem:[#allocation1 + $0x10] sm:$0xff] %v1822_v7  ;;  %325 = vst [vmem:[#allocation1 + $0x110] sm:$0xff] %v1758_v8 }
  0x1b   :  { %357 = vst [vmem:[#allocation1 + $0x100] sm:$0xff] %v1762_v9  ;;  %821 = vst [vmem:[#allocation1 + $0x18] sm:$0xff] %v1823_v13 }
  0x1c   :  { %852 = vst [vmem:[#allocation1 + $0x8] sm:$0xff] %v1827_v14  ;;  %405 = vst [vmem:[#allocation1 + $0xe8] sm:$0xff] %v1771_v15  ;;  %v1100_v26 = vld [vmem:[#allocation1 + $0x24f] ss:$-84 sm:%s1985_s5]   ;;  %s1068_s5 = smov 3 }
  0x1d   :  { %437 = vst [vmem:[#allocation1 + $0xd8] sm:$0xff] %v1775_v17  ;;  %21 = vst [vmem:[#allocation1 + $0x1a8] sm:$0xff] %v1723_v16  ;;  %v1110_v27 = vld [vmem:[#allocation1 + $0x23] ss:$16 sm:%s1998_s13]   ;;  %s2120_s13 = smov 24  ;;  %v1102_v28 = vsel %vm1005_vm0, %v1100_v26, %v1097_v22 }
  0x1e   :  { %309 = vst [vmem:[#allocation1 + $0x118] sm:$0xff] %v1759_v23  ;;  %341 = vst [vmem:[#allocation1 + $0x108] sm:$0xff] %v1763_v24  ;;  %v1107_v29 = vsel %vm1010_vm1, %v1105_v25, %v1102_v28  ;;  %v1069_v39 = vld [vmem:[#allocation1 + $0x183] ss:$16 sm:%s1068_s5]   ;;  %s1377_s5 = smov 3 }
  0x1f   :  { %978 = vst.msk [vmem:[#allocation0 + $0x36] ss:$8 sm:$0x7] %vm867_vm5, %v975_v20   ;;  %988 = vst.msk [vmem:[#allocation0 + $0x48] ss:$8 sm:$0x7] %vm867_vm5, %v985_v21   ;;  %v1112_v31 = vsel %vm1015_vm2, %v1110_v27, %v1107_v29  ;;  %v1073_v4 = vsel %vm1072_vm3, %v1071_v40, %v1069_v39 }
  0x20   :  { %908 = vst.msk [vmem:[#allocation0 + $0x18] ss:$8 sm:$0x7] %vm867_vm5, %v905_v30   ;;  %v1023_v37 = vld [vmem:[#allocation1 + $0x87] ss:$16 sm:%s2028_s3]   ;;  %s1292_s3 = smov 12 }
  0x21   :  { %v1001_v32 = vld [vmem:[#allocation1 + $0x3] ss:$16 sm:%s2000_s14]   ;;  %s2316_s14 = smov 96   ;;  %v1026_v38 = vld [vmem:[#allocation1 + $0x87] ss:$16 sm:%s2040_s10]   ;;  %s1297_s10 = smov 48 }
  0x22   :  { %v1004_v33 = vld [vmem:[#allocation1 + $0x3] ss:$16 sm:%s2014_s23]   ;;  %1113 = vrot.lane.b32.xlu1 %v1112_v31, %s2316_s14  ;;  %v1028_v42 = vsel %vm1005_vm0, %v1026_v38, %v1023_v37  ;;  %v1031_v43 = vld [vmem:[#allocation1 + $0x87] ss:$16 sm:%s2042_s11]   ;;  %v1167_v45 = vld [vmem:[#allocation1 + $0x2] ss:$16 sm:%s2052_s21]  }
  0x23   :  { %v1009_v34 = vld [vmem:[#allocation1 + $0x3] ss:$16 sm:%s2016_s25]   ;;  %v1006_v35 = vsel %vm1005_vm0, %v1004_v33, %v1001_v32  ;;  %v1036_v44 = vld [vmem:[#allocation1 + $0x87] ss:$16 sm:%s2050_s20]   ;;  %v1033_v47 = vsel %vm1010_vm1, %v1031_v43, %v1028_v42  ;;  %v1170_v48 = vld [vmem:[#allocation1 + $0x2] ss:$16 sm:%s2058_s28]  }
  0x24   :  { %v1014_v36 = vld [vmem:[#allocation1 + $0x3] ss:$16 sm:%s2026_s2]   ;;  %v1011_v41 = vsel %vm1010_vm1, %v1009_v34, %v1006_v35  ;;  %v1175_v49 = vld [vmem:[#allocation1 + $0x2] ss:$16 sm:%s2060_s29]   ;;  %v1038_v51 = vsel %vm1015_vm2, %v1036_v44, %v1033_v47  ;;  %v1172_v52 = vsel %vm1005_vm0, %v1170_v48, %v1167_v45  ;;  %v1189_v53 = vld [vmem:[#allocation1 + $0x86] ss:$16 sm:%s2077_s9]  }
  0x25   :  { %v1016_v46 = vsel %vm1015_vm2, %v1014_v36, %v1011_v41  ;;  %v1180_v50 = vld [vmem:[#allocation1 + $0x2] ss:$16 sm:%s2075_s0]   ;;  %v1192_v54 = vld [vmem:[#allocation1 + $0x86] ss:$16 sm:%s2079_s12]   ;;  %v1177_v57 = vsel %vm1010_vm1, %v1175_v49, %v1172_v52  ;;  %v1046_v60 = vld [vmem:[#allocation1 + $0x7] ss:$16 sm:%s2095_s18]  }
  0x26   :  { %v1197_v55 = vld [vmem:[#allocation1 + $0x86] ss:$16 sm:%s2082_s15]   ;;  %v1892_v56 = vpack.i.bf16 %v1038_v51, %v1016_v46  ;;  %v1194_v58 = vsel %vm1005_vm0, %v1192_v54, %v1189_v53  ;;  %v1049_v61 = vld [vmem:[#allocation1 + $0x7] ss:$16 sm:%s2097_s19]   ;;  %v1182_v62 = vsel %vm1015_vm2, %v1180_v50, %v1177_v57  ;;  %v1127_v8 = vld [vmem:[#allocation1 + $0x83] ss:$16 sm:%s2109_s26]  }
  0x27   :  { %v1202_v59 = vld [vmem:[#allocation1 + $0x86] ss:$16 sm:%s2084_s16]   ;;  %v1199_v63 = vsel %vm1010_vm1, %v1197_v55, %v1194_v58  ;;  %v1051_v0 = vsel %vm1005_vm0, %v1049_v61, %v1046_v60  ;;  %v1054_v1 = vld [vmem:[#allocation1 + $0x7] ss:$16 sm:%s2101_s24]   ;;  %v1132_v9 = vld [vmem:[#allocation1 + $0x83] ss:$16 sm:%s2114_s6]  }
  0x28   :  { %v1059_v2 = vld [vmem:[#allocation1 + $0x7] ss:$16 sm:%s2103_s17]   ;;  %1893 = vrot.lane.b32.xlu0 %v1892_v56, %s2316_s14  ;;  %v1204_v6 = vsel %vm1015_vm2, %v1202_v59, %v1199_v63  ;;  %v1056_v7 = vsel %vm1010_vm1, %v1054_v1, %v1051_v0  ;;  %v1137_v10 = vld [vmem:[#allocation1 + $0x83] ss:$16 sm:%s2116_s30]   ;;  %v1212_v17 = vld [vmem:[#allocation1 + $0x6] ss:$16 sm:%s2125_s7]  }
  0x29   :  { %v1124_v3 = vld [vmem:[#allocation1 + $0x107] ss:$16 sm:%s2107_s27]   ;;  %v1902_v11 = vpack.i.bf16 %v1204_v6, %v1182_v62  ;;  %v1061_v12 = vsel %vm1015_vm2, %v1059_v2, %v1056_v7  ;;  %v1076_v14 = vld [vmem:[#allocation1 + $0xd3] ss:$16 sm:%s2120_s13]   ;;  %v1215_v20 = vld [vmem:[#allocation1 + $0x6] ss:$16 sm:%s2128_s8]  }
  0x2a   :  { %v1129_v13 = vsel %vm1005_vm0, %v1127_v8, %v1124_v3  ;;  %v1081_v15 = vld [vmem:[#allocation1 + $0xd3] ss:$16 sm:%s2123_s4]   ;;  %v1078_v19 = vsel %vm1077_vm4, %v1076_v14, %v1073_v4  ;;  %v1220_v21 = vld [vmem:[#allocation1 + $0x6] ss:$16 sm:%s2130_s22]   ;;  %s1224_s23 = smov 192  ;;  %s1289_s25 = smov 3  ;;  %v1217_v24 = vsel %vm1005_vm0, %v1215_v20, %v1212_v17 }
  0x2b   :  { %v1134_v16 = vsel %vm1010_vm1, %v1132_v9, %v1129_v13  ;;  %s1923_s2 = smov 64   ;;  %v1083_v23 = vsel %vm1082_vm6, %v1081_v15, %v1078_v19  ;;  %v1225_v25 = vld [vmem:[#allocation1 + $0x6] ss:$16 sm:%s1224_s23]   ;;  %v1222_v29 = vsel %vm1010_vm1, %v1220_v21, %v1217_v24  ;;  %v1293_v30 = vld [vmem:[#allocation1 + $0x82] ss:$16 sm:%s1292_s3]   ;;  %s1302_s11 = smov 192 }
  0x2c   :  { %1903 = vrot.lane.b32.xlu1 %v1902_v11, %s1923_s2  ;;  %v1139_v22 = vsel %vm1015_vm2, %v1137_v10, %v1134_v16  ;;  %v1290_v26 = vld [vmem:[#allocation1 + $0x106] ss:$16 sm:%s1289_s25]   ;;  %v1087_v28 = vsel %vm1086_vm7, %v1085_v5, %v1083_v23  ;;  %v1298_v31 = vld [vmem:[#allocation1 + $0x82] ss:$16 sm:%s1297_s10]   ;;  %s1234_s20 = smov 3  ;;  %v1227_v33 = vsel %vm1015_vm2, %v1225_v25, %v1222_v29  ;;  %s1241_s21 = smov 24 }
  0x2d   :  { %v1897_v27 = vpack.i.bf16 %v1139_v22, %v1061_v12  ;;  %v1251_v32 = vld [vmem:[#allocation1 + $0x13b] sm:$0x80]   ;;  %v1295_v34 = vsel %vm1005_vm0, %v1293_v30, %v1290_v26  ;;  %s1246_s28 = smov 96  ;;  %s1262_s29 = smov 3  ;;  %v1378_v7 = vld [vmem:[#allocation1 + $0x5] ss:$16 sm:%s1377_s5]  }
  0x2e   :  { %v1303_v35 = vld [vmem:[#allocation1 + $0x82] ss:$16 sm:%s1302_s11]   ;;  %v1300_v37 = vsel %vm1010_vm1, %v1298_v31, %v1295_v34  ;;  %s1265_s0 = smov 12  ;;  %v1263_v43 = vld [vmem:[#allocation1 + $0x186] ss:$16 sm:%s1262_s29]   ;;  %s1270_s9 = smov 48 }
  0x2f   :  { %v1235_v36 = vld [vmem:[#allocation1 + $0x182] ss:$16 sm:%s1234_s20]   ;;  %1898 = vrot.lane.b32.xlu0 %v1897_v27, %s2316_s14  ;;  %v1305_v41 = vsel %vm1015_vm2, %v1303_v35, %v1300_v37  ;;  %s1275_s12 = smov 192  ;;  %s1314_s15 = smov 3  ;;  %v1403_v9 = vld [vmem:[#allocation1 + $0x19f] sm:$0x4]  }
  0x30   :  { %v1239_v38 = vsel %vm1072_vm3, %v1237_v18, %v1235_v36  ;;  %v1242_v39 = vld [vmem:[#allocation1 + $0xd2] ss:$16 sm:%s1241_s21]   ;;  %1088 = vrot.lane.b32.xlu1 %v1087_v28, %s2316_s14  ;;  %v1907_v45 = vpack.i.bf16 %v1305_v41, %v1227_v33  ;;  %s1317_s16 = smov 12  ;;  %v1315_v52 = vld [vmem:[#allocation1 + $0x126] ss:$16 sm:%s1314_s15]   ;;  %s1322_s18 = smov 48 }
  0x31   :  { %v1247_v40 = vld [vmem:[#allocation1 + $0xd2] ss:$16 sm:%s1246_s28]   ;;  %v1244_v42 = vsel %vm1077_vm4, %v1242_v39, %v1239_v38  ;;  %v1318_v53 = vld [vmem:[#allocation1 + $0x126] ss:$16 sm:%s1317_s16]   ;;  %s1332_s19 = smov 3  ;;  %s1335_s24 = smov 12 }
  0x32   :  { %v1266_v44 = vld [vmem:[#allocation1 + $0x24e] ss:$-84 sm:%s1265_s0]   ;;  %v1249_v46 = vsel %vm1082_vm6, %v1247_v40, %v1244_v42  ;;  %v1320_v54 = vsel %vm1005_vm0, %v1318_v53, %v1315_v52  ;;  %v1333_v56 = vld [vmem:[#allocation1 + $0x1] ss:$16 sm:%s1332_s19]   ;;  %s1340_s17 = smov 48  ;;  %s1345_s22 = smov 192 }
  0x33   :  { %v1268_v47 = vsel %vm1005_vm0, %v1266_v44, %v1263_v43  ;;  %v1271_v48 = vld [vmem:[#allocation1 + $0x122] ss:$16 sm:%s1270_s9]   ;;  %v1253_v50 = vsel %vm1086_vm7, %v1251_v32, %v1249_v46  ;;  %1908 = vrot.lane.b32.xlu0 %v1907_v45, %s1923_s2  ;;  %v1323_v55 = vld [vmem:[#allocation1 + $0x126] ss:$16 sm:%s1322_s18]   ;;  %v1336_v58 = vld [vmem:[#allocation1 + $0x1] ss:$16 sm:%s1335_s24]  }
  0x34   :  { %v1276_v49 = vld [vmem:[#allocation1 + $0x22] ss:$16 sm:%s1275_s12]   ;;  %v1273_v51 = vsel %vm1010_vm1, %v1271_v48, %v1268_v47  ;;  %1254 = vrot.lane.b32.xlu1 %v1253_v50, %s1923_s2  ;;  %v1341_v59 = vld [vmem:[#allocation1 + $0x1] ss:$16 sm:%s1340_s17]   ;;  %v1325_v60 = vsel %vm1010_vm1, %v1323_v55, %v1320_v54  ;;  %v1338_v61 = vsel %vm1005_vm0, %v1336_v58, %v1333_v56  ;;  %s1354_s27 = smov 3  ;;  %s1357_s26 = smov 12 }
  0x35   :  { %v1278_v57 = vsel %vm1015_vm2, %v1276_v49, %v1273_v51  ;;  %v1346_v62 = vld [vmem:[#allocation1 + $0x1] ss:$16 sm:%s1345_s22]   ;;  %v1343_v63 = vsel %vm1010_vm1, %v1341_v59, %v1338_v61  ;;  %v1355_v0 = vld [vmem:[#allocation1 + $0x85] ss:$16 sm:%s1354_s27]   ;;  %s1362_s6 = smov 48  ;;  %s1367_s30 = smov 192 }
  0x36   :  { %v1358_v1 = vld [vmem:[#allocation1 + $0x85] ss:$16 sm:%s1357_s26]   ;;  %v1348_v2 = vsel %vm1015_vm2, %v1346_v62, %v1343_v63  ;;  %s1380_s13 = smov 12  ;;  %s1385_s4 = smov 48  ;;  %v1417_v22 = vld [vmem:[#allocation1 + $0x13a] sm:$0x80]  }
  0x37   :  { %1279 = vrot.lane.b32.xlu0 %v1278_v57, %s1923_s2  ;;  %v1360_v3 = vsel %vm1005_vm0, %v1358_v1, %v1355_v0  ;;  %v1363_v4 = vld [vmem:[#allocation1 + $0x85] ss:$16 sm:%s1362_s6]   ;;  %s1390_s7 = smov 192  ;;  %s1455_s8 = smov 3 }
  0x38   :  { %v1368_v5 = vld [vmem:[#allocation1 + $0x85] ss:$16 sm:%s1367_s30]   ;;  %1326 = vrot.lane.b32.xlu1 %v1325_v60, %s1923_s2  ;;  %v1365_v6 = vsel %vm1010_vm1, %v1363_v4, %v1360_v3  ;;  %s1458_s14 = smov 12  ;;  %s1463_s23 = smov 48 }
  0x39   :  { %v1381_v8 = vld [vmem:[#allocation1 + $0x5] ss:$16 sm:%s1380_s13]   ;;  %v1370_v10 = vsel %vm1015_vm2, %v1368_v5, %v1365_v6  ;;  %v1459_v18 = vld [vmem:[#allocation1 + $0x81] ss:$16 sm:%s1458_s14]   ;;  %s1468_s25 = smov 192  ;;  %s1400_s2 = smov 3 }
  0x3a   :  { %v1383_v11 = vsel %vm1005_vm0, %v1381_v8, %v1378_v7  ;;  %v1386_v12 = vld [vmem:[#allocation1 + $0x5] ss:$16 sm:%s1385_s4]   ;;  %v1912_v14 = vpack.i.bf16 %v1370_v10, %v1348_v2  ;;  %v1464_v20 = vld [vmem:[#allocation1 + $0x81] ss:$16 sm:%s1463_s23]   ;;  %s1407_s3 = smov 24  ;;  %s1924_s10 = smov 32  }
  0x3b   :  { %v1391_v13 = vld [vmem:[#allocation1 + $0x5] ss:$16 sm:%s1390_s7]   ;;  %v1388_v15 = vsel %vm1010_vm1, %v1386_v12, %v1383_v11  ;;  %v1469_v21 = vld [vmem:[#allocation1 + $0x81] ss:$16 sm:%s1468_s25]   ;;  %s1412_s11 = smov 96  ;;  %s1428_s20 = smov 3 }
  0x3c   :  { %v1456_v17 = vld [vmem:[#allocation1 + $0x105] ss:$16 sm:%s1455_s8]   ;;  %v1393_v16 = vsel %vm1015_vm2, %v1391_v13, %v1388_v15  ;;  %1913 = vrot.lane.b32.xlu0 %v1912_v14, %s1924_s10  ;;  %v1401_v24 = vld [vmem:[#allocation1 + $0x181] ss:$16 sm:%s1400_s2]   ;;  %s1431_s21 = smov 12  ;;  %s1436_s28 = smov 48 }
  0x3d   :  { %v1461_v19 = vsel %vm1005_vm0, %v1459_v18, %v1456_v17  ;;  %v1408_v25 = vld [vmem:[#allocation1 + $0xd1] ss:$16 sm:%s1407_s3]   ;;  %v1405_v27 = vsel %vm1072_vm3, %v1403_v9, %v1401_v24  ;;  %v1429_v29 = vld [vmem:[#allocation1 + $0x185] ss:$16 sm:%s1428_s20]   ;;  %s1441_s29 = smov 192  ;;  %s1480_s0 = smov 3 }
  0x3e   :  { %v1466_v23 = vsel %vm1010_vm1, %v1464_v20, %v1461_v19  ;;  %v1413_v28 = vld [vmem:[#allocation1 + $0xd1] ss:$16 sm:%s1412_s11]   ;;  %v1410_v31 = vsel %vm1077_vm4, %v1408_v25, %v1405_v27  ;;  %v1481_v37 = vld [vmem:[#allocation1 + $0x125] ss:$16 sm:%s1480_s0]   ;;  %s1483_s9 = smov 12  ;;  %s1488_s12 = smov 48 }
  0x3f   :  { %v1471_v26 = vsel %vm1015_vm2, %v1469_v21, %v1466_v23  ;;  %v1432_v32 = vld [vmem:[#allocation1 + $0x24d] ss:$-84 sm:%s1431_s21]   ;;  %v1415_v34 = vsel %vm1082_vm6, %v1413_v28, %v1410_v31  ;;  %v910_v44 = vld [vmem:[#allocation1 + $0x90] ss:$4 sm:$0x7]  }
  0x40   :  { %v1917_v30 = vpack.i.bf16 %v1471_v26, %v1393_v16  ;;  %v1437_v33 = vld [vmem:[#allocation1 + $0x121] ss:$16 sm:%s1436_s28]   ;;  %v1434_v35 = vsel %vm1005_vm0, %v1432_v32, %v1429_v29  ;;  %v1419_v38 = vsel %vm1086_vm7, %v1417_v22, %v1415_v34  ;;  %v1484_v40 = vld [vmem:[#allocation1 + $0x125] ss:$16 sm:%s1483_s9]  }
  0x41   :  { %v1442_v36 = vld [vmem:[#allocation1 + $0x21] ss:$16 sm:%s1441_s29]   ;;  %v1439_v39 = vsel %vm1010_vm1, %v1437_v33, %v1434_v35  ;;  %v1489_v41 = vld [vmem:[#allocation1 + $0x125] ss:$16 sm:%s1488_s12]   ;;  %1420 = vrot.lane.b32.xlu0 %v1419_v38, %s1924_s10  ;;  %v1486_v43 = vsel %vm1005_vm0, %v1484_v40, %v1481_v37 }
  0x42   :  { %1918 = vrot.lane.b32.xlu1 %v1917_v30, %s1924_s10  ;;  %v1444_v42 = vsel %vm1015_vm2, %v1442_v36, %v1439_v39  ;;  %v970_v45 = vld [vmem:[#allocation1 + $0x150] ss:$4 sm:$0x7]   ;;  %v1491_v46 = vsel %vm1010_vm1, %v1489_v41, %v1486_v43  ;;  %913 = vst.msk [vmem:[#allocation0 + $0x19] ss:$8 sm:$0x7] %vm867_vm5, %v910_v44  }
  0x43   :  { %973 = vst.msk [vmem:[#allocation0 + $0x35] ss:$8 sm:$0x7] %vm867_vm5, %v970_v45   ;;  %v980_v47 = vld [vmem:[#allocation1 + $0x170] ss:$4 sm:$0x7]  }
  0x44   :  { %v990_v48 = vld [vmem:[#allocation1 + $0x190] ss:$4 sm:$0x7]   ;;  %983 = vst.msk [vmem:[#allocation0 + $0x37] ss:$8 sm:$0x7] %vm867_vm5, %v980_v47  }
  0x45   :  { %993 = vst.msk [vmem:[#allocation0 + $0x49] ss:$8 sm:$0x7] %vm867_vm5, %v990_v48   ;;  %v995_v49 = vld [vmem:[#allocation1 + $0x1a0] ss:$4 sm:$0x7]   ;;  %1492 = vrot.lane.b32.xlu0 %v1491_v46, %s1924_s10 }
  0x46   :  { %v866_v50 = vld [vmem:[#allocation1] ss:$4 sm:$0x7]   ;;  %1445 = vrot.lane.b32.xlu1 %v1444_v42, %s1924_s10  ;;  %998 = vst.msk [vmem:[#allocation0 + $0x4a] ss:$8 sm:$0x7] %vm867_vm5, %v995_v49  }
  0x47   :  { %868 = vst.msk [vmem:[#allocation0] ss:$8 sm:$0x7] %vm867_vm5, %v866_v50   ;;  %v870_v51 = vld [vmem:[#allocation1 + $0x10] ss:$4 sm:$0x7]  }
  0x48   :  { %v875_v52 = vld [vmem:[#allocation1 + $0x20] ss:$4 sm:$0x7]   ;;  %873 = vst.msk [vmem:[#allocation0 + $0x1] ss:$8 sm:$0x7] %vm867_vm5, %v870_v51  }
  0x49   :  { %878 = vst.msk [vmem:[#allocation0 + $0x2] ss:$8 sm:$0x7] %vm867_vm5, %v875_v52   ;;  %v880_v53 = vld [vmem:[#allocation1 + $0x30] ss:$4 sm:$0x7]  }
  0x4a   :  { %v885_v54 = vld [vmem:[#allocation1 + $0x40] ss:$4 sm:$0x7]   ;;  %883 = vst.msk [vmem:[#allocation0 + $0x3] ss:$8 sm:$0x7] %vm867_vm5, %v880_v53  }
  0x4b   :  { %888 = vst.msk [vmem:[#allocation0 + $0x4] ss:$8 sm:$0x7] %vm867_vm5, %v885_v54   ;;  %v890_v55 = vld [vmem:[#allocation1 + $0x50] ss:$4 sm:$0x7]  }
  0x4c   :  { %v895_v56 = vld [vmem:[#allocation1 + $0x60] ss:$4 sm:$0x7]   ;;  %893 = vst.msk [vmem:[#allocation0 + $0x5] ss:$8 sm:$0x7] %vm867_vm5, %v890_v55  }
  0x4d   :  { %898 = vst.msk [vmem:[#allocation0 + $0x6] ss:$8 sm:$0x7] %vm867_vm5, %v895_v56   ;;  %v900_v57 = vld [vmem:[#allocation1 + $0x70] ss:$4 sm:$0x7]  }
  0x4e   :  { %v915_v58 = vld [vmem:[#allocation1 + $0xa0] ss:$4 sm:$0x7]   ;;  %903 = vst.msk [vmem:[#allocation0 + $0x7] ss:$8 sm:$0x7] %vm867_vm5, %v900_v57  }
  0x4f   :  { %918 = vst.msk [vmem:[#allocation0 + $0x1a] ss:$8 sm:$0x7] %vm867_vm5, %v915_v58   ;;  %v920_v59 = vld [vmem:[#allocation1 + $0xb0] ss:$4 sm:$0x7]  }
  0x50   :  { %v925_v60 = vld [vmem:[#allocation1 + $0xc0] ss:$4 sm:$0x7]   ;;  %923 = vst.msk [vmem:[#allocation0 + $0x1b] ss:$8 sm:$0x7] %vm867_vm5, %v920_v59  }
  0x51   :  { %928 = vst.msk [vmem:[#allocation0 + $0x1c] ss:$8 sm:$0x7] %vm867_vm5, %v925_v60   ;;  %v930_v61 = vld [vmem:[#allocation1 + $0xd0] ss:$4 sm:$0x7]  }
  0x52   :  { %v935_v62 = vld [vmem:[#allocation1 + $0xe0] ss:$4 sm:$0x7]   ;;  %933 = vst.msk [vmem:[#allocation0 + $0x1d] ss:$8 sm:$0x7] %vm867_vm5, %v930_v61  }
  0x53   :  { %938 = vst.msk [vmem:[#allocation0 + $0x1e] ss:$8 sm:$0x7] %vm867_vm5, %v935_v62   ;;  %v940_v63 = vld [vmem:[#allocation1 + $0xf0] ss:$4 sm:$0x7]  }
  0x54   :  { %v945_v0 = vld [vmem:[#allocation1 + $0x100] ss:$4 sm:$0x7]   ;;  %943 = vst.msk [vmem:[#allocation0 + $0x1f] ss:$8 sm:$0x7] %vm867_vm5, %v940_v63  }
  0x55   :  { %948 = vst.msk [vmem:[#allocation0 + $0x30] ss:$8 sm:$0x7] %vm867_vm5, %v945_v0   ;;  %v950_v1 = vld [vmem:[#allocation1 + $0x110] ss:$4 sm:$0x7]  }
  0x56   :  { %v955_v2 = vld [vmem:[#allocation1 + $0x120] ss:$4 sm:$0x7]   ;;  %953 = vst.msk [vmem:[#allocation0 + $0x31] ss:$8 sm:$0x7] %vm867_vm5, %v950_v1  }
  0x57   :  { %958 = vst.msk [vmem:[#allocation0 + $0x32] ss:$8 sm:$0x7] %vm867_vm5, %v955_v2   ;;  %v960_v3 = vld [vmem:[#allocation1 + $0x130] ss:$4 sm:$0x7]  }
  0x58   :  { %v965_v4 = vld [vmem:[#allocation1 + $0x140] ss:$4 sm:$0x7]   ;;  %963 = vst.msk [vmem:[#allocation0 + $0x33] ss:$8 sm:$0x7] %vm867_vm5, %v960_v3  }
  0x59   :  { %968 = vst.msk [vmem:[#allocation0 + $0x34] ss:$8 sm:$0x7] %vm867_vm5, %v965_v4   ;;  %v1515_v40 = vld [vmem:[#allocation0 + $0x10] sm:$0xff]  ;;  %v1587_v41 = vld [vmem:[#allocation0 + $0x58] sm:$0xff] }
  0x5b   :  { %v1539_v30 = vld [vmem:[#allocation0 + $0x28] sm:$0xff] }
  0x60   :  { %v1563_v35 = vld [vmem:[#allocation0 + $0x40] sm:$0xff] }
  0x88   :  { %v1161_v5 = vpop.permute.xlu0 %1160  }
  0x89   :  { %1164 = vst.msk [vmem:[#allocation0 + $0x3a] sm:$0x3f] %vm1019_vm8, %v1161_v5  }
  0x94   :  { %v1114_v6 = vpop.permute.xlu1 %1113  }
  0x95   :  { %1117 = vst.msk [vmem:[#allocation0 + $0x50] sm:$0x7] %vm1019_vm8, %v1114_v6   ;;  %1119 = vst.msk [vmem:[#allocation0 + $0x32] sm:$0x38] %vm1019_vm8, %v1114_v6  }
  0x96   :  { %1121 = vst.msk [vmem:[#allocation0 + $0x12] sm:$0xc0] %vm1019_vm8, %v1114_v6  }
  0x9a   :  { %v1894_v7 = vpop.permute.xlu0 %1893 }
  0x9b   :  { %v1896_v8 = vunpack.i.h.bf16 %v1894_v7  ;;  %v1895_v9 = vunpack.i.l.bf16 %v1894_v7 }
  0x9d   :  { %1020 = vst.msk [vmem:[#allocation0] sm:$0xff] %vm1019_vm8, %v1895_v9   ;;  %1043 = vst.msk [vmem:[#allocation0 + $0x20] sm:$0xff] %vm1019_vm8, %v1896_v8  }
  0x9e   :  { %v1904_v10 = vpop.permute.xlu1 %1903 }
  0x9f   :  { %v1906_v11 = vunpack.i.h.bf16 %v1904_v10  ;;  %v1905_v12 = vunpack.i.l.bf16 %v1904_v10 }
  0xa1   :  { %1209 = vst.msk [vmem:[#allocation0 + $0x20] sm:$0xff] %vm1185_vm9, %v1906_v11   ;;  %1186 = vst.msk [vmem:[#allocation0] sm:$0xff] %vm1185_vm9, %v1905_v12   ;;  %v1899_v13 = vpop.permute.xlu0 %1898 }
  0xa2   :  { %v1901_v14 = vunpack.i.h.bf16 %v1899_v13  ;;  %v1900_v15 = vunpack.i.l.bf16 %v1899_v13  ;;  %v1089_v17 = vpop.permute.xlu1 %1088  }
  0xa3   :  { %1092 = vst.msk [vmem:[#allocation0 + $0x48] sm:$0x7] %vm1019_vm8, %v1089_v17   ;;  %1094 = vst.msk [vmem:[#allocation0 + $0x2d] sm:$0xf8] %vm1019_vm8, %v1089_v17  }
  0xa4   :  { %1066 = vst.msk [vmem:[#allocation0 + $0x8] sm:$0xff] %vm1019_vm8, %v1900_v15   ;;  %1146 = vst.msk [vmem:[#allocation0 + $0x18] sm:$0xfc] %vm1019_vm8, %v1901_v14  }
  0xa5   :  { %1144 = vst.msk [vmem:[#allocation0 + $0x38] sm:$0x3] %vm1019_vm8, %v1901_v14   ;;  %v1909_v18 = vpop.permute.xlu0 %1908 }
  0xa6   :  { %v1911_v16 = vunpack.i.h.bf16 %v1909_v18  ;;  %v1910_v19 = vunpack.i.l.bf16 %v1909_v18  ;;  %v1255_v20 = vpop.permute.xlu1 %1254  }
  0xa7   :  { %1258 = vst.msk [vmem:[#allocation0 + $0x48] sm:$0x7] %vm1185_vm9, %v1255_v20   ;;  %1260 = vst.msk [vmem:[#allocation0 + $0x2d] sm:$0xf8] %vm1185_vm9, %v1255_v20  }
  0xa8   :  { %1232 = vst.msk [vmem:[#allocation0 + $0x8] sm:$0xff] %vm1185_vm9, %v1910_v19   ;;  %1310 = vst.msk [vmem:[#allocation0 + $0x38] sm:$0x3] %vm1185_vm9, %v1911_v16  }
  0xa9   :  { %1312 = vst.msk [vmem:[#allocation0 + $0x18] sm:$0xfc] %vm1185_vm9, %v1911_v16   ;;  %v1280_v21 = vpop.permute.xlu0 %1279  }
  0xaa   :  { %1283 = vst.msk [vmem:[#allocation0 + $0x50] sm:$0x7] %vm1185_vm9, %v1280_v21   ;;  %1285 = vst.msk [vmem:[#allocation0 + $0x32] sm:$0x38] %vm1185_vm9, %v1280_v21   ;;  %v1327_v22 = vpop.permute.xlu1 %1326  }
  0xab   :  { %1287 = vst.msk [vmem:[#allocation0 + $0x12] sm:$0xc0] %vm1185_vm9, %v1280_v21   ;;  %1330 = vst.msk [vmem:[#allocation0 + $0x3a] sm:$0x3f] %vm1185_vm9, %v1327_v22  }
  0xae   :  { %v1914_v23 = vpop.permute.xlu0 %1913 }
  0xaf   :  { %v1916_v24 = vunpack.i.h.bf16 %v1914_v23  ;;  %v1915_v25 = vunpack.i.l.bf16 %v1914_v23 }
  0xb1   :  { %1352 = vst.msk [vmem:[#allocation0] sm:$0xff] %vm1351_vm10, %v1915_v25   ;;  %1375 = vst.msk [vmem:[#allocation0 + $0x20] sm:$0xff] %vm1351_vm10, %v1916_v24  }
  0xb3   :  { %v1421_v29 = vpop.permute.xlu0 %1420  }
  0xb4   :  { %v1919_v26 = vpop.permute.xlu1 %1918  ;;  %1424 = vst.msk [vmem:[#allocation0 + $0x48] sm:$0x7] %vm1351_vm10, %v1421_v29   ;;  %1426 = vst.msk [vmem:[#allocation0 + $0x2d] sm:$0xf8] %vm1351_vm10, %v1421_v29  }
  0xb5   :  { %v1921_v27 = vunpack.i.h.bf16 %v1919_v26  ;;  %v1920_v28 = vunpack.i.l.bf16 %v1919_v26 }
  0xb7   :  { %1476 = vst.msk [vmem:[#allocation0 + $0x38] sm:$0x3] %vm1351_vm10, %v1921_v27   ;;  %1478 = vst.msk [vmem:[#allocation0 + $0x18] sm:$0xfc] %vm1351_vm10, %v1921_v27   ;;  %v1493_v32 = vpop.permute.xlu0 %1492  }
  0xb8   :  { %1398 = vst.msk [vmem:[#allocation0 + $0x8] sm:$0xff] %vm1351_vm10, %v1920_v28   ;;  %v1446_v31 = vpop.permute.xlu1 %1445   ;;  %v1531_v33 = vld [vmem:[#allocation0 + $0x20] sm:$0xff]  ;;  %1496 = vst.msk [vmem:[#allocation0 + $0x3a] sm:$0x3f] %vm1351_vm10, %v1493_v32  }
  0xb9   :  { %1449 = vst.msk [vmem:[#allocation0 + $0x50] sm:$0x7] %vm1351_vm10, %v1446_v31   ;;  %1451 = vst.msk [vmem:[#allocation0 + $0x32] sm:$0x38] %vm1351_vm10, %v1446_v31   ;;  %v1841_v34 = vpack.c.bf16 %v1539_v30, %v1531_v33  ;;  %v1502_v36 = vld [vmem:[#allocation0] sm:$0xff] }
  0xba   :  { %1453 = vst.msk [vmem:[#allocation0 + $0x12] sm:$0xc0] %vm1351_vm10, %v1446_v31  }
  0xbb   :  { %1885 = vst [vmem:[%s2313_s1 + $0x10] sm:$0xff] %v1841_v34   ;;  %v1571_v37 = vld [vmem:[#allocation0 + $0x48] sm:$0xff] }
  0xbc   :  { %v1851_v39 = vpack.c.bf16 %v1571_v37, %v1563_v35 }
  0xbe   :  { %1887 = vst [vmem:[%s2313_s1 + $0x20] sm:$0xff] %v1851_v39  }
  0xbf   :  { %v1508_v38 = vld [vmem:[#allocation0 + $0x8] sm:$0xff]  ;;  %v1555_v48 = vld [vmem:[#allocation0 + $0x38] sm:$0xff] }
  0xc0   :  { %v1831_v42 = vpack.c.bf16 %v1508_v38, %v1502_v36  ;;  %v1579_v44 = vld [vmem:[#allocation0 + $0x50] sm:$0xff] }
  0xc1   :  { %v1523_v43 = vld [vmem:[#allocation0 + $0x18] sm:$0xff]  ;;  %v1856_v46 = vpack.c.bf16 %v1587_v41, %v1579_v44  ;;  %v1547_v47 = vld [vmem:[#allocation0 + $0x30] sm:$0xff] }
  0xc2   :  { %1832 = vst [vmem:[%s2313_s1] sm:$0xff] %v1831_v42   ;;  %v1836_v45 = vpack.c.bf16 %v1523_v43, %v1515_v40  ;;  %v1846_v49 = vpack.c.bf16 %v1555_v48, %v1547_v47 }
  0xc3   :  { %1888 = vst [vmem:[%s2313_s1 + $0x28] sm:$0xff] %v1856_v46  }
  0xc4   :  { %1884 = vst [vmem:[%s2313_s1 + $0x8] sm:$0xff] %v1836_v45   ;;  %1886 = vst [vmem:[%s2313_s1 + $0x18] sm:$0xff] %v1846_v49  }

// kernel: tile.18
= control target key start
LH: loop header
LB: loop body
LE: loop exit
PB: predicated region body
PF: predicated region fallthrough
CT: control target
= control target key end

     0   :  { %s28_s0 = inlined_call_operand.vmem [shape: f32[32], index: 0, kind: input, shape index: {}]   ;;  %s29_s1 = inlined_call_operand.vmem [shape: f32[9,32], index: 1, kind: output, shape index: {}]  }
   0x1   :  { %v4_v0 = vld [vmem:[%s28_s0] ss:$0 sm:$0xff] }
   0x2   :  { %5 = vst [vmem:[%s29_s1] sm:$0xff] %v4_v0  ;;  %8 = vst [vmem:[%s29_s1 + $0x8] sm:$0xff] %v4_v0 }

// kernel: tile.19
= control target key start
LH: loop header
LB: loop body
LE: loop exit
PB: predicated region body
PF: predicated region fallthrough
CT: control target
= control target key end

     0   :  { %s6_s6 = smov 3  ;;  %s13_s11 = smov 3  ;;  %vm3_vm0 = vcmask 261120   ;;  %vm10_vm1 = vcmask 1048320   ;;  %vm17_vm2 = vcmask 785920   ;;  %vm24_vm3 = vcmask 523520   ;;  %s90_s0 = inlined_call_operand.vmem [shape: f32[9,32], index: 0, kind: input, shape index: {}]   ;;  %s91_s1 = inlined_call_operand.vmem [shape: f32[1,288], index: 1, kind: output, shape index: {}]  }
   0x1   :  { %v2_v0 = vld [vmem:[%s90_s0] ss:$4 sm:$0x7]   ;;  %v48_v1 = vld [vmem:[%s90_s0 + $0x3] ss:$4 sm:%s6_s6]   ;;  %s56_s12 = smov 96  }
   0x2   :  { %8 = vrot.lane.b32.xlu0 %v48_v1, %s56_s12  ;;  %s20_s13 = smov 3  ;;  %4 = vst.msk [vmem:[#allocation0] ss:$8 sm:$0x7] %vm3_vm0, %v2_v0   ;;  %v49_v2 = vld [vmem:[%s90_s0 + $0x2] ss:$4 sm:%s13_s11]  }
   0x3   :  { %v50_v3 = vld [vmem:[%s90_s0 + $0x1] ss:$4 sm:%s20_s13]   ;;  %s57_s0 = smov 32   ;;  %s58_s18 = smov 64  }
   0x4   :  { %22 = vrot.lane.b32.xlu1 %v50_v3, %s57_s0 }
   0x6   :  { %15 = vrot.lane.b32.xlu0 %v49_v2, %s58_s18 }
   0x9   :  { %v41_v4 = vld [vmem:[#allocation0 + $0x10] sm:$0x1] }
   0xa   :  { %52 = vst [vmem:[%s91_s1 + $0x2] sm:$0x1] %v41_v4 }
  0x74   :  { %v9_v5 = vpop.permute.xlu0 %8  }
  0x75   :  { %11 = vst.msk [vmem:[#allocation0] ss:$8 sm:$0x3] %vm10_vm1, %v9_v5  }
  0x76   :  { %v23_v6 = vpop.permute.xlu1 %22  }
  0x78   :  { %v16_v7 = vpop.permute.xlu0 %15  }
  0x79   :  { %18 = vst.msk [vmem:[#allocation0] ss:$8 sm:$0x3] %vm17_vm2, %v16_v7  }
  0x7a   :  { %25 = vst.msk [vmem:[#allocation0] ss:$8 sm:$0x3] %vm24_vm3, %v23_v6  }
  0x81   :  { %v30_v8 = vld [vmem:[#allocation0] sm:$0x1]  ;;  %v35_v9 = vld [vmem:[#allocation0 + $0x8] sm:$0x1] }
  0x82   :  { %33 = vst [vmem:[%s91_s1] sm:$0x1] %v30_v8  ;;  %51 = vst [vmem:[%s91_s1 + $0x1] sm:$0x1] %v35_v9 }

// kernel: evaluator_forward.1
= control target key start
LH: loop header
LB: loop body
LE: loop exit
PB: predicated region body
PF: predicated region fallthrough
CT: control target
= control target key end

     0   :  { %v1196_v1 = vmov 0.0   ;;  %v1197_v2 = vmov 0   ;;  %vm1198_vm0 = vmmov 0   ;;  %vm132_vm1 = vcmask 261120   ;;  %s1685_s1 = inlined_call_operand.vmem [shape: bf16[32,288], index: 1, kind: input, shape index: {}]   ;;  %s1686_s0 = inlined_call_operand.vmem [shape: bf16[98,32], index: 0, kind: input, shape index: {}]   ;;  %s1687_s4 = inlined_call_operand.vmem [shape: f32[288,1], index: 4, kind: input, shape index: {}]   ;;  %s1688_s2 = inlined_call_operand.vmem [shape: f32[1,288], index: 2, kind: input, shape index: {}]   ;;  %s1689_s3 = inlined_call_operand.vmem [shape: f32[98,288], index: 3, kind: input, shape index: {}]   ;;  %s1690_s6 = inlined_call_operand.<no memory space> [shape: f32[1,1], index: 6, kind: input, shape index: {}]   ;;  %s1691_s5 = inlined_call_operand.vmem [shape: f32[2,98], index: 5, kind: input, shape index: {}]   ;;  %s1692_s7 = inlined_call_operand.vmem [shape: f32[2,128], index: 7, kind: output, shape index: {}]  }
   0x1   :  { %v1177_v0 = vld [vmem:[%s1685_s1 + $0x1c] ss:$12 sps:$4 sm:$0xff]   ;;  %1065 = vmatprep.subr.bf16.mxu1 %v1196_v1  ;;  %186 = vmatprep.mubr.bf16.mxu0 %v1197_v2  ;;  %v1179_v3 = vld [vmem:[%s1685_s1 + $0x18] ss:$12 sps:$4 sm:$0xff]   ;;  %v1180_v4 = vld [vmem:[%s1685_s1 + $0x20] ss:$12 sps:$4 sm:$0xff]   ;;  %v52_v51 = vlaneseq }
   0x2   :  { %1069 = vmatprep.mubr.msk.bf16.mxu1 %vm1198_vm0, %v1196_v1  ;;  %1176 = vset.pattern.permute.xlu0 %v1197_v2  ;;  %v1181_v5 = vld [vmem:[%s1685_s1 + $0x4] ss:$12 sps:$4 sm:$0xff]   ;;  %v1183_v6 = vld [vmem:[%s1685_s1] ss:$12 sps:$4 sm:$0xff]   ;;  %v1184_v7 = vld [vmem:[%s1685_s1 + $0x8] ss:$12 sps:$4 sm:$0xff]  }
   0x3   :  { %166 = vmatprep.subr.bf16.mxu0 %v1177_v0  ;;  %1066 = vmatpush3.bf16.msra.mxu1 %v1180_v4  ;;  %v1185_v8 = vld [vmem:[%s1686_s0] sm:$0xff]   ;;  %v491_v9 = vld [vmem:[%s1687_s4 + $0xf8] sm:$0xff]  ;;  %v490_v11 = vld [vmem:[%s1687_s4 + $0xf0] sm:$0xff]  ;;  %v53_v52 = vshrl.u32 %v52_v51, 7  ;;  %vm807_vm2 = vcmask 1041408   ;;  %vm803_vm3 = vcmask 801792  }
   0x4   :  { %167 = vmatpush1.bf16.msra.mxu0 %v1179_v3  ;;  %1067 = vmatprep.subr.bf16.mxu1 %v1196_v1  ;;  %v475_v10 = vld [vmem:[%s1687_s4 + $0x78] sm:$0xff]  ;;  %v474_v12 = vld [vmem:[%s1687_s4 + $0x70] sm:$0xff]  ;;  %v489_v13 = vld [vmem:[%s1687_s4 + $0xe8] sm:$0xff] }
   0x5   :  { %168 = vmatprep.subr.bf16.mxu0 %v1181_v5  ;;  %v1186_v14 = vld [vmem:[%s1686_s0 + $0x8] sm:$0xff]   ;;  %v495_v16 = vld [vmem:[%s1687_s4 + $0x118] sm:$0xff]  ;;  %v488_v17 = vld [vmem:[%s1687_s4 + $0xe0] sm:$0xff]  ;;  %v54_v53 = vsub.s32 0, %v53_v52  ;;  %v62_v55 = vsub.s32 2, %v53_v52  ;;  %v58_v56 = vsub.s32 1, %v53_v52 }
   0x6   :  { %v473_v15 = vld [vmem:[%s1687_s4 + $0x68] sm:$0xff]  ;;  %v472_v18 = vld [vmem:[%s1687_s4 + $0x60] sm:$0xff]  ;;  %v487_v19 = vld [vmem:[%s1687_s4 + $0xd8] sm:$0xff] }
   0x7   :  { %1068 = vmatpush3.bf16.msra.mxu1 %v1184_v7  ;;  %v471_v20 = vld [vmem:[%s1687_s4 + $0x58] sm:$0xff]  ;;  %v494_v21 = vld [vmem:[%s1687_s4 + $0x110] sm:$0xff]  ;;  %v485_v25 = vld [vmem:[%s1687_s4 + $0xc8] sm:$0xff] }
   0x8   :  { %169 = vmatpush1.bf16.msra.mxu0 %v1183_v6  ;;  %1097 = vmatprep.subr.mxu1 %v1196_v1  ;;  %v486_v22 = vld [vmem:[%s1687_s4 + $0xd0] sm:$0xff]  ;;  %v469_v26 = vld [vmem:[%s1687_s4 + $0x48] sm:$0xff]  ;;  %v484_v27 = vld [vmem:[%s1687_s4 + $0xc0] sm:$0xff] }
   0x9   :  { %963 = vmatprep.subr.mxu0 %v491_v9  ;;  %v470_v23 = vld [vmem:[%s1687_s4 + $0x50] sm:$0xff]  ;;  %v468_v28 = vld [vmem:[%s1687_s4 + $0x40] sm:$0xff]  ;;  %v483_v29 = vld [vmem:[%s1687_s4 + $0xb8] sm:$0xff] }
   0xa   :  { %1070 = vmatmul.mubr.msk.bf16.vlgmr.msra.gmra.mxu1 %vm132_vm1, %v1185_v8  ;;  %v1187_v24 = vld [vmem:[%s1686_s0 + $0x10] sm:$0xff]   ;;  %v467_v30 = vld [vmem:[%s1687_s4 + $0x38] sm:$0xff]  ;;  %v481_v34 = vld [vmem:[%s1687_s4 + $0xa8] sm:$0xff] }
   0xb   :  { %924 = vmatmul.mubr.msk.bf16.vlgmr.msra.gmra.mxu0 %vm132_vm1, %v1185_v8  ;;  %1073 = vmatprep.mubr.msk.bf16.mxu1 %vm1198_vm0, %v1196_v1  ;;  %v1188_v31 = vld [vmem:[%s1686_s0 + $0x18] sm:$0xff]   ;;  %v482_v32 = vld [vmem:[%s1687_s4 + $0xb0] sm:$0xff]  ;;  %v465_v35 = vld [vmem:[%s1687_s4 + $0x28] sm:$0xff] }
   0xc   :  { %196 = vmatprep.mubr.bf16.mxu0 %v1197_v2  ;;  %964 = vmatpush3.msra.mxu0 %v475_v10  ;;  %v466_v33 = vld [vmem:[%s1687_s4 + $0x30] sm:$0xff]  ;;  %v1189_v36 = vld [vmem:[%s1686_s0 + $0x20] sm:$0xff]   ;;  %v1190_v37 = vld [vmem:[%s1686_s0 + $0x28] sm:$0xff]  }
   0xd   :  { %965 = vmatprep.subr.mxu0 %v490_v11  ;;  %1098 = vmatpush3.msra.mxu1 %v495_v16  ;;  %v1191_v38 = vld [vmem:[%s1686_s0 + $0x30] ss:$0 sps:$4 sm:$0x11]   ;;  %v480_v39 = vld [vmem:[%s1687_s4 + $0xa0] sm:$0xff]  ;;  %v479_v41 = vld [vmem:[%s1687_s4 + $0x98] sm:$0xff] }
   0xe   :  { %966 = vmatpush3.msra.mxu0 %v474_v12  ;;  %1099 = vmatprep.subr.mxu1 %v1196_v1  ;;  %v464_v40 = vld [vmem:[%s1687_s4 + $0x20] sm:$0xff]  ;;  %v463_v42 = vld [vmem:[%s1687_s4 + $0x18] sm:$0xff]  ;;  %v478_v43 = vld [vmem:[%s1687_s4 + $0x90] sm:$0xff] }
   0xf   :  { %967 = vmatprep.subr.mxu0 %v489_v13  ;;  %1100 = vmatpush3.msra.mxu1 %v494_v21  ;;  %v462_v44 = vld [vmem:[%s1687_s4 + $0x10] sm:$0xff]  ;;  %v493_v45 = vld [vmem:[%s1687_s4 + $0x108] sm:$0xff]  ;;  %v492_v48 = vld [vmem:[%s1687_s4 + $0x100] sm:$0xff] }
  0x10   :  { %968 = vmatpush3.msra.mxu0 %v473_v15  ;;  %1101 = vmatprep.subr.mxu1 %v1196_v1  ;;  %v477_v46 = vld [vmem:[%s1687_s4 + $0x88] sm:$0xff]  ;;  %v476_v49 = vld [vmem:[%s1687_s4 + $0x80] sm:$0xff] }
  0x11   :  { %969 = vmatprep.subr.mxu0 %v488_v17  ;;  %1102 = vmatpush3.msra.mxu1 %v493_v45  ;;  %v461_v47 = vld [vmem:[%s1687_s4 + $0x8] sm:$0xff]  ;;  %v460_v50 = vld [vmem:[%s1687_s4] sm:$0xff] }
  0x12   :  { %1074 = vmatmul.mubr.msk.bf16.gmra.mxu1 %vm132_vm1, %v1186_v14  ;;  %970 = vmatpush3.msra.mxu0 %v472_v18  ;;  %v50_v54 = vld [vmem:[%s1688_s2] sm:$0x7]  ;;  %v383_v7 = vld [vmem:[%s1689_s3 + $0x8] sm:$0xff] }
  0x13   :  { %925 = vmatmul.mubr.msk.bf16.gmra.mxu0 %vm132_vm1, %v1186_v14  ;;  %1077 = vmatprep.mubr.msk.bf16.mxu1 %vm1198_vm0, %v1196_v1  ;;  %v1435_v57 = vrot.slane %v50_v54, %v54_v53  ;;  %v1437_v58 = vrot.slane %v50_v54, %v62_v55  ;;  %v1439_v59 = vrot.slane %v50_v54, %v58_v56  ;;  %v382_v9 = vld [vmem:[%s1689_s3] sm:$0xff]  ;;  %v387_v17 = vld [vmem:[%s1689_s3 + $0x28] sm:$0xff]  ;;  %v392_v56 = vld [vmem:[%s1689_s3 + $0x50] sm:$0xff] }
  0x14   :  { %206 = vmatprep.mubr.bf16.mxu0 %v1197_v2  ;;  %971 = vmatprep.subr.mxu0 %v487_v19 }
  0x15   :  { %972 = vmatpush3.msra.mxu0 %v471_v20  ;;  %1103 = vmatprep.subr.mxu1 %v1196_v1 }
  0x16   :  { %973 = vmatprep.subr.mxu0 %v486_v22  ;;  %1104 = vmatpush3.msra.mxu1 %v492_v48 }
  0x17   :  { %974 = vmatpush3.msra.mxu0 %v470_v23  ;;  %v386_v23 = vld [vmem:[%s1689_s3 + $0x20] sm:$0xff] }
  0x18   :  { %975 = vmatprep.subr.mxu0 %v485_v25  ;;  %v385_v25 = vld [vmem:[%s1689_s3 + $0x18] sm:$0xff] }
  0x19   :  { %976 = vmatpush3.msra.mxu0 %v469_v26 }
  0x1a   :  { %1078 = vmatmul.mubr.msk.bf16.gmra.mxu1 %vm132_vm1, %v1187_v24  ;;  %977 = vmatprep.subr.mxu0 %v484_v27 }
  0x1b   :  { %926 = vmatmul.mubr.msk.bf16.gmra.mxu0 %vm132_vm1, %v1187_v24  ;;  %1081 = vmatprep.mubr.msk.bf16.mxu1 %vm1198_vm0, %v1196_v1 }
  0x1c   :  { %216 = vmatprep.mubr.bf16.mxu0 %v1197_v2  ;;  %978 = vmatpush3.msra.mxu0 %v468_v28 }
  0x1d   :  { %979 = vmatprep.subr.mxu0 %v483_v29 }
  0x1e   :  { %980 = vmatpush3.msra.mxu0 %v467_v30 }
  0x1f   :  { %981 = vmatprep.subr.mxu0 %v482_v32 }
  0x20   :  { %982 = vmatpush3.msra.mxu0 %v466_v33  ;;  %v390_v33 = vld [vmem:[%s1689_s3 + $0x40] sm:$0xff] }
  0x21   :  { %983 = vmatprep.subr.mxu0 %v481_v34 }
  0x22   :  { %1082 = vmatmul.mubr.msk.bf16.gmra.mxu1 %vm132_vm1, %v1188_v31  ;;  %984 = vmatpush3.msra.mxu0 %v465_v35 }
  0x23   :  { %927 = vmatmul.mubr.msk.bf16.gmra.mxu0 %vm132_vm1, %v1188_v31  ;;  %1085 = vmatprep.mubr.msk.bf16.mxu1 %vm1198_vm0, %v1196_v1 }
  0x24   :  { %226 = vmatprep.mubr.bf16.mxu0 %v1197_v2  ;;  %985 = vmatprep.subr.mxu0 %v480_v39  ;;  %v389_v39 = vld [vmem:[%s1689_s3 + $0x38] sm:$0xff] }
  0x25   :  { %986 = vmatpush3.msra.mxu0 %v464_v40 }
  0x26   :  { %987 = vmatprep.subr.mxu0 %v479_v41  ;;  %v388_v41 = vld [vmem:[%s1689_s3 + $0x30] sm:$0xff] }
  0x27   :  { %988 = vmatpush3.msra.mxu0 %v463_v42 }
  0x28   :  { %989 = vmatprep.subr.mxu0 %v478_v43 }
  0x29   :  { %990 = vmatpush3.msra.mxu0 %v462_v44 }
  0x2a   :  { %1086 = vmatmul.mubr.msk.bf16.gmra.mxu1 %vm132_vm1, %v1189_v36  ;;  %991 = vmatprep.subr.mxu0 %v477_v46 }
  0x2b   :  { %928 = vmatmul.mubr.msk.bf16.gmra.mxu0 %vm132_vm1, %v1189_v36  ;;  %1089 = vmatprep.mubr.msk.bf16.mxu1 %vm1198_vm0, %v1196_v1 }
  0x2c   :  { %236 = vmatprep.mubr.bf16.mxu0 %v1197_v2  ;;  %992 = vmatpush3.msra.mxu0 %v461_v47 }
  0x2d   :  { %993 = vmatprep.subr.mxu0 %v476_v49  ;;  %v393_v49 = vld [vmem:[%s1689_s3 + $0x58] sm:$0xff] }
  0x2e   :  { %994 = vmatpush3.msra.mxu0 %v460_v50 }
  0x2f   :  { %1144 = vmatprep.subr.mxu0 %v1196_v1 }
  0x32   :  { %1090 = vmatmul.mubr.msk.bf16.gmra.mxu1 %vm132_vm1, %v1190_v37 }
  0x33   :  { %929 = vmatmul.mubr.msk.bf16.gmra.mxu0 %vm132_vm1, %v1190_v37  ;;  %1093 = vmatprep.mubr.msk.bf16.mxu1 %vm1198_vm0, %v1196_v1 }
  0x34   :  { %246 = vmatprep.mubr.bf16.mxu0 %v1197_v2  ;;  %v384_v2 = vld [vmem:[%s1689_s3 + $0x10] sm:$0xff] }
  0x3a   :  { %1094 = vmatmul.mubr.msk.bf16.gmra.mxu1 %vm132_vm1, %v1191_v38 }
  0x3b   :  { %930 = vmatmul.mubr.msk.bf16.gmra.mxu0 %vm132_vm1, %v1191_v38  ;;  %1105 = vmatprep.mubr.msk.f32.mxu1 %vm1198_vm0, %v1196_v1 }
  0xca   :  { %v289_v62 = vpop.f32.mrf.mxu1 }
  0xcb   :  { %v188_v60 = vpop.f32.mrf.mxu0  ;;  %v290_v63 = vadd.f32 %v289_v62, %v1437_v58 }
  0xcc   :  { %v189_v61 = vadd.f32 %v188_v60, %v1435_v57  ;;  %v1071_v4 = vpop.f32.mrf.mxu1 }
  0xcd   :  { %v190_v0 = vpop.f32.mrf.mxu0  ;;  %v345_v6 = vmax.f32 %v290_v63, 0.0 }
  0xce   :  { %v191_v3 = vadd.f32 %v190_v0, %v1439_v59  ;;  %v343_v5 = vmax.f32 %v189_v61, 0.0  ;;  %v292_v12 = vpop.f32.mrf.mxu1  ;;  %v391_v61 = vld [vmem:[%s1689_s3 + $0x48] sm:$0xff] }
  0xcf   :  { %v192_v8 = vpop.f32.mrf.mxu0  ;;  %v423_v13 = vmul.f32 %v384_v2, %v345_v6  ;;  %v293_v14 = vadd.f32 %v292_v12, %v1437_v58  ;;  %v396_v6 = vld [vmem:[%s1689_s3 + $0x70] sm:$0xff]  ;;  %v395_v12 = vld [vmem:[%s1689_s3 + $0x68] sm:$0xff] }
  0xd0   :  { %v344_v10 = vmax.f32 %v191_v3, 0.0  ;;  %v193_v11 = vadd.f32 %v192_v8, %v1435_v57  ;;  %v1072_v19 = vpop.f32.mrf.mxu1  ;;  %v421_v20 = vmul.f32 %v382_v9, %v343_v5 }
  0xd1   :  { %v194_v15 = vpop.f32.mrf.mxu0  ;;  %v348_v22 = vmax.f32 %v293_v14, 0.0  ;;  %1106 = vmatmul.mubr.msk.f32.vlgmr.msra.gmra.mxu1 %vm132_vm1, %v423_v13  ;;  %v394_v14 = vld [vmem:[%s1689_s3 + $0x60] sm:$0xff] }
  0xd2   :  { %v422_v16 = vmul.f32 %v383_v7, %v344_v10  ;;  %v195_v18 = vadd.f32 %v194_v15, %v1439_v59  ;;  %v346_v21 = vmax.f32 %v193_v11, 0.0  ;;  %v297_v28 = vpop.f32.mrf.mxu1  ;;  %1108 = vmatprep.mubr.msk.f32.mxu1 %vm1198_vm0, %v1196_v1 }
  0xd3   :  { %v198_v24 = vpop.f32.mrf.mxu0  ;;  %v426_v29 = vmul.f32 %v387_v17, %v348_v22  ;;  %v298_v30 = vadd.f32 %v297_v28, %v1437_v58  ;;  %v399_v22 = vld [vmem:[%s1689_s3 + $0x88] sm:$0xff]  ;;  %v398_v28 = vld [vmem:[%s1689_s3 + $0x80] sm:$0xff] }
  0xd4   :  { %v347_v26 = vmax.f32 %v195_v18, 0.0  ;;  %v199_v27 = vadd.f32 %v198_v24, %v1435_v57  ;;  %599 = vmatprep.mubr.f32.mxu0 %v422_v16  ;;  %v1075_v35 = vpop.f32.mrf.mxu1  ;;  %v424_v36 = vmul.f32 %v385_v25, %v346_v21 }
  0xd5   :  { %v200_v31 = vpop.f32.mrf.mxu0  ;;  %600 = vmatmul.mubr.f32.vlgmr.msra.gmra.mxu0 %v421_v20  ;;  %v351_v38 = vmax.f32 %v298_v30, 0.0  ;;  %1109 = vmatmul.mubr.msk.f32.gmra.mxu1 %vm132_vm1, %v426_v29  ;;  %v397_v30 = vld [vmem:[%s1689_s3 + $0x78] sm:$0xff] }
  0xd6   :  { %v425_v32 = vmul.f32 %v386_v23, %v347_v26  ;;  %v201_v34 = vadd.f32 %v200_v31, %v1439_v59  ;;  %v349_v37 = vmax.f32 %v199_v27, 0.0  ;;  %v300_v44 = vpop.f32.mrf.mxu1  ;;  %1111 = vmatprep.mubr.msk.f32.mxu1 %vm1198_vm0, %v1196_v1 }
  0xd7   :  { %v202_v40 = vpop.f32.mrf.mxu0  ;;  %v429_v45 = vmul.f32 %v390_v33, %v351_v38  ;;  %v301_v46 = vadd.f32 %v300_v44, %v1437_v58  ;;  %v402_v38 = vld [vmem:[%s1689_s3 + $0xa0] sm:$0xff]  ;;  %v401_v44 = vld [vmem:[%s1689_s3 + $0x98] sm:$0xff] }
  0xd8   :  { %v350_v42 = vmax.f32 %v201_v34, 0.0  ;;  %v203_v43 = vadd.f32 %v202_v40, %v1435_v57  ;;  %604 = vmatprep.mubr.f32.mxu0 %v425_v32  ;;  %v1076_v52 = vpop.f32.mrf.mxu1  ;;  %v427_v53 = vmul.f32 %v388_v41, %v349_v37 }
  0xd9   :  { %v204_v47 = vpop.f32.mrf.mxu0  ;;  %605 = vmatmul.mubr.f32.gmra.mxu0 %v424_v36  ;;  %v354_v55 = vmax.f32 %v301_v46, 0.0  ;;  %1112 = vmatmul.mubr.msk.f32.gmra.mxu1 %vm132_vm1, %v429_v45  ;;  %v400_v46 = vld [vmem:[%s1689_s3 + $0x90] sm:$0xff] }
  0xda   :  { %v428_v48 = vmul.f32 %v389_v39, %v350_v42  ;;  %v205_v50 = vadd.f32 %v204_v47, %v1439_v59  ;;  %v352_v54 = vmax.f32 %v203_v43, 0.0  ;;  %v305_v0 = vpop.f32.mrf.mxu1  ;;  %1114 = vmatprep.mubr.msk.f32.mxu1 %vm1198_vm0, %v1196_v1 }
  0xdb   :  { %v208_v60 = vpop.f32.mrf.mxu0  ;;  %v432_v2 = vmul.f32 %v393_v49, %v354_v55  ;;  %v306_v3 = vadd.f32 %v305_v0, %v1437_v58  ;;  %v405_v55 = vld [vmem:[%s1689_s3 + $0xb8] sm:$0xff]  ;;  %v404_v0 = vld [vmem:[%s1689_s3 + $0xb0] sm:$0xff] }
  0xdc   :  { %v353_v62 = vmax.f32 %v205_v50, 0.0  ;;  %v209_v63 = vadd.f32 %v208_v60, %v1435_v57  ;;  %609 = vmatprep.mubr.f32.mxu0 %v428_v48  ;;  %v1079_v8 = vpop.f32.mrf.mxu1  ;;  %v430_v9 = vmul.f32 %v391_v61, %v352_v54 }
  0xdd   :  { %v210_v4 = vpop.f32.mrf.mxu0  ;;  %610 = vmatmul.mubr.f32.gmra.mxu0 %v427_v53  ;;  %v357_v11 = vmax.f32 %v306_v3, 0.0  ;;  %1115 = vmatmul.mubr.msk.f32.gmra.mxu1 %vm132_vm1, %v432_v2  ;;  %v403_v3 = vld [vmem:[%s1689_s3 + $0xa8] sm:$0xff] }
  0xde   :  { %v431_v5 = vmul.f32 %v392_v56, %v353_v62  ;;  %v211_v7 = vadd.f32 %v210_v4, %v1439_v59  ;;  %v355_v10 = vmax.f32 %v209_v63, 0.0  ;;  %v308_v17 = vpop.f32.mrf.mxu1  ;;  %1117 = vmatprep.mubr.msk.f32.mxu1 %vm1198_vm0, %v1196_v1 }
  0xdf   :  { %v212_v13 = vpop.f32.mrf.mxu0  ;;  %v435_v18 = vmul.f32 %v396_v6, %v357_v11  ;;  %v309_v19 = vadd.f32 %v308_v17, %v1437_v58  ;;  %v408_v11 = vld [vmem:[%s1689_s3 + $0xd0] sm:$0xff]  ;;  %v407_v17 = vld [vmem:[%s1689_s3 + $0xc8] sm:$0xff] }
  0xe0   :  { %v356_v15 = vmax.f32 %v211_v7, 0.0  ;;  %v213_v16 = vadd.f32 %v212_v13, %v1435_v57  ;;  %614 = vmatprep.mubr.f32.mxu0 %v431_v5  ;;  %v1080_v24 = vpop.f32.mrf.mxu1  ;;  %v433_v25 = vmul.f32 %v394_v14, %v355_v10 }
  0xe1   :  { %v214_v20 = vpop.f32.mrf.mxu0  ;;  %615 = vmatmul.mubr.f32.gmra.mxu0 %v430_v9  ;;  %v360_v27 = vmax.f32 %v309_v19, 0.0  ;;  %1118 = vmatmul.mubr.msk.f32.gmra.mxu1 %vm132_vm1, %v435_v18  ;;  %v406_v19 = vld [vmem:[%s1689_s3 + $0xc0] sm:$0xff] }
  0xe2   :  { %v434_v21 = vmul.f32 %v395_v12, %v356_v15  ;;  %v215_v23 = vadd.f32 %v214_v20, %v1439_v59  ;;  %v358_v26 = vmax.f32 %v213_v16, 0.0  ;;  %v313_v33 = vpop.f32.mrf.mxu1  ;;  %1120 = vmatprep.mubr.msk.f32.mxu1 %vm1198_vm0, %v1196_v1 }
  0xe3   :  { %v218_v29 = vpop.f32.mrf.mxu0  ;;  %v438_v34 = vmul.f32 %v399_v22, %v360_v27  ;;  %v314_v35 = vadd.f32 %v313_v33, %v1437_v58  ;;  %v411_v27 = vld [vmem:[%s1689_s3 + $0xe8] sm:$0xff]  ;;  %v410_v33 = vld [vmem:[%s1689_s3 + $0xe0] sm:$0xff] }
  0xe4   :  { %v359_v31 = vmax.f32 %v215_v23, 0.0  ;;  %v219_v32 = vadd.f32 %v218_v29, %v1435_v57  ;;  %619 = vmatprep.mubr.f32.mxu0 %v434_v21  ;;  %v1083_v40 = vpop.f32.mrf.mxu1  ;;  %v436_v41 = vmul.f32 %v397_v30, %v358_v26 }
  0xe5   :  { %v220_v36 = vpop.f32.mrf.mxu0  ;;  %620 = vmatmul.mubr.f32.gmra.mxu0 %v433_v25  ;;  %v363_v43 = vmax.f32 %v314_v35, 0.0  ;;  %1121 = vmatmul.mubr.msk.f32.gmra.mxu1 %vm132_vm1, %v438_v34  ;;  %v409_v35 = vld [vmem:[%s1689_s3 + $0xd8] sm:$0xff] }
  0xe6   :  { %v437_v37 = vmul.f32 %v398_v28, %v359_v31  ;;  %v221_v39 = vadd.f32 %v220_v36, %v1439_v59  ;;  %v361_v42 = vmax.f32 %v219_v32, 0.0  ;;  %v316_v49 = vpop.f32.mrf.mxu1  ;;  %1123 = vmatprep.mubr.msk.f32.mxu1 %vm1198_vm0, %v1196_v1 }
  0xe7   :  { %v222_v45 = vpop.f32.mrf.mxu0  ;;  %v441_v50 = vmul.f32 %v402_v38, %v363_v43  ;;  %v317_v52 = vadd.f32 %v316_v49, %v1437_v58  ;;  %v414_v43 = vld [vmem:[%s1689_s3 + $0x100] sm:$0xff]  ;;  %v413_v49 = vld [vmem:[%s1689_s3 + $0xf8] sm:$0xff] }
  0xe8   :  { %v362_v47 = vmax.f32 %v221_v39, 0.0  ;;  %v223_v48 = vadd.f32 %v222_v45, %v1435_v57  ;;  %624 = vmatprep.mubr.f32.mxu0 %v437_v37  ;;  %v1084_v60 = vpop.f32.mrf.mxu1  ;;  %v439_v61 = vmul.f32 %v400_v46, %v361_v42 }
  0xe9   :  { %v224_v53 = vpop.f32.mrf.mxu0  ;;  %625 = vmatmul.mubr.f32.gmra.mxu0 %v436_v41  ;;  %v366_v63 = vmax.f32 %v317_v52, 0.0  ;;  %1124 = vmatmul.mubr.msk.f32.gmra.mxu1 %vm132_vm1, %v441_v50  ;;  %v412_v52 = vld [vmem:[%s1689_s3 + $0xf0] sm:$0xff] }
  0xea   :  { %v440_v54 = vmul.f32 %v401_v44, %v362_v47  ;;  %v225_v56 = vadd.f32 %v224_v53, %v1439_v59  ;;  %v364_v62 = vmax.f32 %v223_v48, 0.0  ;;  %v321_v6 = vpop.f32.mrf.mxu1  ;;  %1126 = vmatprep.mubr.msk.f32.mxu1 %vm1198_vm0, %v1196_v1 }
  0xeb   :  { %v228_v2 = vpop.f32.mrf.mxu0  ;;  %v444_v7 = vmul.f32 %v405_v55, %v366_v63  ;;  %v322_v8 = vadd.f32 %v321_v6, %v1437_v58  ;;  %v417_v63 = vld [vmem:[%s1689_s3 + $0x118] sm:$0xff]  ;;  %v416_v6 = vld [vmem:[%s1689_s3 + $0x110] sm:$0xff] }
  0xec   :  { %v365_v4 = vmax.f32 %v225_v56, 0.0  ;;  %v229_v5 = vadd.f32 %v228_v2, %v1435_v57  ;;  %629 = vmatprep.mubr.f32.mxu0 %v440_v54  ;;  %v1087_v13 = vpop.f32.mrf.mxu1  ;;  %v442_v14 = vmul.f32 %v403_v3, %v364_v62 }
  0xed   :  { %v230_v9 = vpop.f32.mrf.mxu0  ;;  %630 = vmatmul.mubr.f32.gmra.mxu0 %v439_v61  ;;  %v369_v16 = vmax.f32 %v322_v8, 0.0  ;;  %1127 = vmatmul.mubr.msk.f32.gmra.mxu1 %vm132_vm1, %v444_v7  ;;  %v415_v8 = vld [vmem:[%s1689_s3 + $0x108] sm:$0xff] }
  0xee   :  { %v443_v10 = vmul.f32 %v404_v0, %v365_v4  ;;  %v231_v12 = vadd.f32 %v230_v9, %v1439_v59  ;;  %v367_v15 = vmax.f32 %v229_v5, 0.0  ;;  %v324_v22 = vpop.f32.mrf.mxu1  ;;  %1129 = vmatprep.mubr.msk.f32.mxu1 %vm1198_vm0, %v1196_v1 }
  0xef   :  { %v232_v18 = vpop.f32.mrf.mxu0  ;;  %v447_v23 = vmul.f32 %v408_v11, %v369_v16  ;;  %v325_v24 = vadd.f32 %v324_v22, %v1437_v58  ;;  %v420_v16 = vld [vmem:[%s1689_s3 + $0x130] sm:$0x3] }
  0xf0   :  { %v368_v20 = vmax.f32 %v231_v12, 0.0  ;;  %v233_v21 = vadd.f32 %v232_v18, %v1435_v57  ;;  %634 = vmatprep.mubr.f32.mxu0 %v443_v10  ;;  %v1088_v29 = vpop.f32.mrf.mxu1  ;;  %v445_v30 = vmul.f32 %v406_v19, %v367_v15 }
  0xf1   :  { %v234_v25 = vpop.f32.mrf.mxu0  ;;  %635 = vmatmul.mubr.f32.gmra.mxu0 %v442_v14  ;;  %v372_v32 = vmax.f32 %v325_v24, 0.0  ;;  %1130 = vmatmul.mubr.msk.f32.gmra.mxu1 %vm132_vm1, %v447_v23  ;;  %v12_v29 = vstv %s1690_s6 }
  0xf2   :  { %v446_v26 = vmul.f32 %v407_v17, %v368_v20  ;;  %v235_v28 = vadd.f32 %v234_v25, %v1439_v59  ;;  %v370_v31 = vmax.f32 %v233_v21, 0.0  ;;  %v329_v38 = vpop.f32.mrf.mxu1  ;;  %1132 = vmatprep.mubr.msk.f32.mxu1 %vm1198_vm0, %v1196_v1  ;;  %v419_v21 = vld [vmem:[%s1689_s3 + $0x128] sm:$0x3]  ;;  %13 = vst [vmem:[#allocation2] sm:$0x1] %v12_v29 }
  0xf3   :  { %v238_v34 = vpop.f32.mrf.mxu0  ;;  %v450_v39 = vmul.f32 %v411_v27, %v372_v32  ;;  %v330_v40 = vadd.f32 %v329_v38, %v1437_v58 }
  0xf4   :  { %v371_v36 = vmax.f32 %v235_v28, 0.0  ;;  %v239_v37 = vadd.f32 %v238_v34, %v1435_v57  ;;  %639 = vmatprep.mubr.f32.mxu0 %v446_v26  ;;  %v1091_v45 = vpop.f32.mrf.mxu1  ;;  %v448_v46 = vmul.f32 %v409_v35, %v370_v31 }
  0xf5   :  { %v240_v41 = vpop.f32.mrf.mxu0  ;;  %640 = vmatmul.mubr.f32.gmra.mxu0 %v445_v30  ;;  %v375_v48 = vmax.f32 %v330_v40, 0.0  ;;  %1133 = vmatmul.mubr.msk.f32.gmra.mxu1 %vm132_vm1, %v450_v39 }
  0xf6   :  { %v449_v42 = vmul.f32 %v410_v33, %v371_v36  ;;  %v241_v44 = vadd.f32 %v240_v41, %v1439_v59  ;;  %v373_v47 = vmax.f32 %v239_v37, 0.0  ;;  %v332_v55 = vpop.f32.mrf.mxu1  ;;  %1135 = vmatprep.mubr.msk.f32.mxu1 %vm1198_vm0, %v1196_v1 }
  0xf7   :  { %v242_v50 = vpop.f32.mrf.mxu0  ;;  %v453_v56 = vmul.f32 %v414_v43, %v375_v48  ;;  %v333_v60 = vadd.f32 %v332_v55, %v1437_v58 }
  0xf8   :  { %v374_v53 = vmax.f32 %v241_v44, 0.0  ;;  %v243_v54 = vadd.f32 %v242_v50, %v1435_v57  ;;  %644 = vmatprep.mubr.f32.mxu0 %v449_v42  ;;  %v1092_v2 = vpop.f32.mrf.mxu1  ;;  %v451_v3 = vmul.f32 %v412_v52, %v373_v47 }
  0xf9   :  { %v244_v61 = vpop.f32.mrf.mxu0  ;;  %645 = vmatmul.mubr.f32.gmra.mxu0 %v448_v46  ;;  %v378_v5 = vmax.f32 %v333_v60, 0.0  ;;  %1136 = vmatmul.mubr.msk.f32.gmra.mxu1 %vm132_vm1, %v453_v56 }
  0xfa   :  { %v452_v62 = vmul.f32 %v413_v49, %v374_v53  ;;  %v245_v0 = vadd.f32 %v244_v61, %v1439_v59  ;;  %v376_v4 = vmax.f32 %v243_v54, 0.0  ;;  %v337_v11 = vpop.f32.mrf.mxu1  ;;  %1138 = vmatprep.mubr.msk.f32.mxu1 %vm1198_vm0, %v1196_v1 }
  0xfb   :  { %v248_v7 = vpop.f32.mrf.mxu0  ;;  %v456_v12 = vmul.f32 %v417_v63, %v378_v5  ;;  %v338_v13 = vadd.f32 %v337_v11, %v1437_v58  ;;  %v418_v58 = vld [vmem:[%s1689_s3 + $0x120] sm:$0x3] }
  0xfc   :  { %v377_v9 = vmax.f32 %v245_v0, 0.0  ;;  %v249_v10 = vadd.f32 %v248_v7, %v1435_v57  ;;  %649 = vmatprep.mubr.f32.mxu0 %v452_v62  ;;  %v1095_v18 = vpop.f32.mrf.mxu1  ;;  %v454_v19 = vmul.f32 %v415_v8, %v376_v4 }
  0xfd   :  { %v250_v14 = vpop.f32.mrf.mxu0  ;;  %650 = vmatmul.mubr.f32.gmra.mxu0 %v451_v3  ;;  %v381_v20 = vmax.f32 %v338_v13, 0.0  ;;  %1139 = vmatmul.mubr.msk.f32.gmra.mxu1 %vm132_vm1, %v456_v12 }
  0xfe   :  { %v455_v15 = vmul.f32 %v416_v6, %v377_v9  ;;  %v251_v17 = vadd.f32 %v250_v14, %v1439_v59  ;;  %v379_v57 = vmax.f32 %v249_v10, 0.0  ;;  %v340_v24 = vpop.f32.mrf.mxu1  ;;  %1141 = vmatprep.mubr.msk.f32.mxu1 %vm1198_vm0, %v1196_v1 }
  0xff   :  { %v252_v22 = vpop.f32.mrf.mxu0  ;;  %v459_v59 = vmul.f32 %v420_v16, %v381_v20 }
 0x100   :  { %v380_v23 = vmax.f32 %v251_v17, 0.0  ;;  %654 = vmatprep.mubr.f32.mxu0 %v455_v15  ;;  %v1096_v27 = vpop.f32.mrf.mxu1  ;;  %v457_v28 = vmul.f32 %v418_v58, %v379_v57 }
 0x101   :  { %v253_v25 = vpop.f32.mrf.mxu0  ;;  %655 = vmatmul.mubr.f32.gmra.mxu0 %v454_v19  ;;  %1142 = vmatmul.mubr.msk.f32.gmra.mxu1 %vm132_vm1, %v459_v59 }
 0x102   :  { %v458_v26 = vmul.f32 %v419_v21, %v380_v23 }
 0x104   :  { %659 = vmatprep.mubr.f32.mxu0 %v458_v26 }
 0x105   :  { %660 = vmatmul.mubr.f32.gmra.mxu0 %v457_v28 }
 0x106   :  { %1170 = vmatprep.mubr.msk.f32.mxu0 %vm1198_vm0, %v1196_v1 }
 0x191   :  { %v731_v30 = vpop.f32.mrf.mxu1 }
 0x193   :  { %v1107_v32 = vpop.f32.mrf.mxu1 }
 0x195   :  { %v995_v31 = vpop.f32.mrf.mxu0  ;;  %v736_v34 = vpop.f32.mrf.mxu1 }
 0x197   :  { %v996_v33 = vpop.f32.mrf.mxu0  ;;  %v1110_v37 = vpop.f32.mrf.mxu1 }
 0x198   :  { %v997_v35 = vadd.f32 %v996_v33, %v995_v31 }
 0x199   :  { %v998_v36 = vpop.f32.mrf.mxu0  ;;  %v1641_v40 = vpop.f32.mrf.mxu1 }
 0x19a   :  { %v1639_v38 = vadd.f32 %v997_v35, %v731_v30 }
 0x19b   :  { %v999_v39 = vpop.f32.mrf.mxu0  ;;  %v1113_v43 = vpop.f32.mrf.mxu1 }
 0x19c   :  { %v1000_v41 = vadd.f32 %v999_v39, %v998_v36 }
 0x19d   :  { %v1643_v42 = vpop.f32.mrf.mxu0  ;;  %v1649_v46 = vpop.f32.mrf.mxu1 }
 0x19e   :  { %v1645_v44 = vadd.f32 %v1000_v41, %v736_v34 }
 0x19f   :  { %v1647_v45 = vpop.f32.mrf.mxu0  ;;  %v1116_v48 = vpop.f32.mrf.mxu1 }
 0x1a1   :  { %v1651_v47 = vpop.f32.mrf.mxu0  ;;  %v1655_v50 = vpop.f32.mrf.mxu1 }
 0x1a3   :  { %v1653_v49 = vpop.f32.mrf.mxu0  ;;  %v1119_v53 = vpop.f32.mrf.mxu1 }
 0x1a4   :  { %v1006_v43 = vadd.f32 %v1653_v49, %v1651_v47  ;;  %v1003_v53 = vadd.f32 %v1647_v45, %v1643_v42  ;;  %v795_v42 = vld [vmem:[%s1691_s5] sm:$0x3] }
 0x1a5   :  { %v1007_v52 = vpop.f32.mrf.mxu0  ;;  %v756_v55 = vpop.f32.mrf.mxu1  ;;  %v951_v45 = vld [vmem:[#allocation2] ss:$0 sm:$0xff] }
 0x1a7   :  { %v1008_v54 = vpop.f32.mrf.mxu0  ;;  %v1122_v60 = vpop.f32.mrf.mxu1 }
 0x1a8   :  { %v1009_v39 = vadd.f32 %v1008_v54, %v1007_v52  ;;  %v747_v52 = vadd.f32 %v1006_v43, %v1649_v46  ;;  %v742_v54 = vadd.f32 %v1003_v53, %v1641_v40 }
 0x1a9   :  { %v1010_v56 = vpop.f32.mrf.mxu0  ;;  %v761_v62 = vpop.f32.mrf.mxu1 }
 0x1ab   :  { %v1011_v61 = vpop.f32.mrf.mxu0  ;;  %v1125_v0 = vpop.f32.mrf.mxu1 }
 0x1ac   :  { %v1012_v36 = vadd.f32 %v1011_v61, %v1010_v56  ;;  %v752_v56 = vadd.f32 %v1009_v39, %v1655_v50  ;;  %v888_v61 = vand.u32 127, %v52_v51 }
 0x1ad   :  { %v1013_v63 = vpop.f32.mrf.mxu0  ;;  %v766_v3 = vpop.f32.mrf.mxu1 }
 0x1ae   :  { %v757_v48 = vadd.f32 %v1012_v36, %v756_v55  ;;  %vm902_vm4 = vcmp.eq.s32.totalorder %v888_v61, 2  ;;  %vm901_vm5 = vcmp.eq.s32.totalorder %v888_v61, 1  ;;  %vm899_vm6 = vcmp.eq.s32.totalorder %v888_v61, 0 }
 0x1af   :  { %v1014_v2 = vpop.f32.mrf.mxu0  ;;  %v1128_v5 = vpop.f32.mrf.mxu1 }
 0x1b0   :  { %v1015_v34 = vadd.f32 %v1014_v2, %v1013_v63 }
 0x1b1   :  { %v1016_v4 = vpop.f32.mrf.mxu0  ;;  %v771_v7 = vpop.f32.mrf.mxu1 }
 0x1b2   :  { %v762_v41 = vadd.f32 %v1015_v34, %v761_v62 }
 0x1b3   :  { %v1017_v6 = vpop.f32.mrf.mxu0  ;;  %v1131_v9 = vpop.f32.mrf.mxu1 }
 0x1b4   :  { %v1018_v32 = vadd.f32 %v1017_v6, %v1016_v4 }
 0x1b5   :  { %v1019_v8 = vpop.f32.mrf.mxu0  ;;  %v776_v11 = vpop.f32.mrf.mxu1 }
 0x1b6   :  { %v767_v37 = vadd.f32 %v1018_v32, %v766_v3 }
 0x1b7   :  { %v1020_v10 = vpop.f32.mrf.mxu0  ;;  %v1134_v13 = vpop.f32.mrf.mxu1 }
 0x1b8   :  { %v1021_v30 = vadd.f32 %v1020_v10, %v1019_v8 }
 0x1b9   :  { %v1022_v12 = vpop.f32.mrf.mxu0  ;;  %v781_v15 = vpop.f32.mrf.mxu1 }
 0x1ba   :  { %v772_v35 = vadd.f32 %v1021_v30, %v771_v7 }
 0x1bb   :  { %v1023_v14 = vpop.f32.mrf.mxu0  ;;  %v1137_v17 = vpop.f32.mrf.mxu1 }
 0x1bc   :  { %v1024_v28 = vadd.f32 %v1023_v14, %v1022_v12 }
 0x1bd   :  { %v1025_v16 = vpop.f32.mrf.mxu0  ;;  %v786_v19 = vpop.f32.mrf.mxu1 }
 0x1be   :  { %v777_v33 = vadd.f32 %v1024_v28, %v776_v11 }
 0x1bf   :  { %v1026_v18 = vpop.f32.mrf.mxu0  ;;  %v1140_v20 = vpop.f32.mrf.mxu1 }
 0x1c0   :  { %v1027_v26 = vadd.f32 %v1026_v18, %v1025_v16 }
 0x1c1   :  { %v1028_v57 = vpop.f32.mrf.mxu0  ;;  %v791_v22 = vpop.f32.mrf.mxu1 }
 0x1c2   :  { %v782_v31 = vadd.f32 %v1027_v26, %v781_v15 }
 0x1c3   :  { %v1029_v21 = vpop.f32.mrf.mxu0  ;;  %v1143_v23 = vpop.f32.mrf.mxu1 }
 0x1c4   :  { %v1030_v59 = vadd.f32 %v1029_v21, %v1028_v57 }
 0x1c5   :  { %v1031_v58 = vpop.f32.mrf.mxu0 }
 0x1c6   :  { %v787_v29 = vadd.f32 %v1030_v59, %v786_v19 }
 0x1c7   :  { %v1032_v24 = vpop.f32.mrf.mxu0 }
 0x1c8   :  { %v1033_v25 = vadd.f32 %v1032_v24, %v1031_v58 }
 0x1ca   :  { %v792_v27 = vadd.f32 %v1033_v25, %v791_v22 }
 0x1cc   :  { %1145 = vmatpush3.msk.msra.mxu0 %vm807_vm2, %v792_v27 }
 0x1cd   :  { %1146 = vmatprep.subr.mxu0 %v1196_v1 }
 0x1ce   :  { %1147 = vmatpush3.msra.mxu0 %v787_v29 }
 0x1cf   :  { %1148 = vmatprep.subr.mxu0 %v1196_v1 }
 0x1d0   :  { %1149 = vmatpush3.msra.mxu0 %v782_v31 }
 0x1d1   :  { %1150 = vmatprep.subr.mxu0 %v1196_v1 }
 0x1d2   :  { %1151 = vmatpush3.msra.mxu0 %v777_v33 }
 0x1d3   :  { %1152 = vmatprep.subr.mxu0 %v1196_v1 }
 0x1d4   :  { %1153 = vmatpush3.msra.mxu0 %v772_v35 }
 0x1d5   :  { %1154 = vmatprep.subr.mxu0 %v1196_v1 }
 0x1d6   :  { %1155 = vmatpush3.msra.mxu0 %v767_v37 }
 0x1d7   :  { %1156 = vmatprep.subr.mxu0 %v1196_v1 }
 0x1d8   :  { %1157 = vmatpush3.msra.mxu0 %v762_v41 }
 0x1d9   :  { %1158 = vmatprep.subr.mxu0 %v1196_v1 }
 0x1da   :  { %1159 = vmatpush3.msra.mxu0 %v757_v48 }
 0x1db   :  { %1160 = vmatprep.subr.mxu0 %v1196_v1 }
 0x1dc   :  { %1161 = vmatpush3.msra.mxu0 %v752_v56 }
 0x1dd   :  { %1162 = vmatprep.subr.mxu0 %v1196_v1 }
 0x1de   :  { %1163 = vmatpush3.msra.mxu0 %v747_v52 }
 0x1df   :  { %1164 = vmatprep.subr.mxu0 %v1196_v1 }
 0x1e0   :  { %1165 = vmatpush3.msra.mxu0 %v742_v54 }
 0x1e1   :  { %1166 = vmatprep.subr.mxu0 %v1196_v1 }
 0x1e2   :  { %1167 = vmatpush3.msra.mxu0 %v1645_v44 }
 0x1e3   :  { %1168 = vmatprep.subr.mxu0 %v1196_v1 }
 0x1e4   :  { %1169 = vmatpush3.msra.mxu0 %v1639_v38 }
 0x1e5   :  { %1171 = vmatmul.mubr.msk.f32.vlgmr.msra.gmra.mxu0 %vm803_vm3, %v795_v42 }
 0x2a5   :  { %v877_v40 = vpop.f32.mrf.mxu0 }
 0x2a6   :  { %v878_v46 = vadd.f32 %v951_v45, %v877_v40 }
 0x2a7   :  { %v1172_v47 = vpop.f32.mrf.mxu0 }
 0x2a8   :  { %v881_v49 = vsub.f32 0.0, %v878_v46 }
 0x2aa   :  { %v882_v50 = vmul.f32 1.442695, %v881_v49 }
 0x2ac   :  { %1192 = vpow2.f32 %v882_v50 }
 0x2b9   :  { %v1193_v55 = vpop.eup %1192 }
 0x2ba   :  { %v884_v60 = vadd.f32 1.0, %v1193_v55 }
 0x2bc   :  { %1194 = vrcp.f32 %v884_v60 }
 0x2c9   :  { %v1195_v44 = vpop.eup %1194 }
 0x2ca   :  { %891 = vperm.xlu0 %1176, %v1195_v44  }
 0x2ce   :  { %896 = vperm.xlu0 %1176, %v878_v46  }
 0x345   :  { %v892_v62 = vpop.permute.xlu0 %891 }
 0x346   :  { %v900_v38 = vsub.f32 1.0, %v892_v62 }
 0x349   :  { %v897_v1 = vpop.permute.xlu0 %896 }
 0x34a   :  { %v903_v63 = vsel %vm902_vm4, %v897_v1, 0.0 }
 0x34b   :  { %v904_v0 = vsel %vm901_vm5, %v892_v62, %v903_v63 }
 0x34c   :  { %v905_v2 = vsel %vm899_vm6, %v900_v38, %v904_v0 }
 0x34d   :  { %906 = vst [vmem:[%s1692_s7] sm:$0x3] %v905_v2 }

</bundles_post_ra>
